<compile_context>
chip_gen: v7x
topology: tpu7x:2x2x1
jax: 0.10.0
libtpu: 0.0.40
codegen_flags: <defaults>
</compile_context>

<pallas_src>
import functools

import numpy as np
import jax
import jax.numpy as jnp
from jax.experimental import pallas as pl
from jax.experimental.pallas import tpu as pltpu

CLIP_MEAN = (0.48145466, 0.4578275, 0.40821073)
CLIP_STD = (0.26862954, 0.26130258, 0.27577711)

OUT_LANES = 128                      # lane-dense output width
VMEM_BUDGET_BYTES = 48 * 1024 * 1024  # safe on v5e/v6e (128 MiB) and v7x (64 MiB)


def _round_up(x, m):
    return ((x + m - 1) // m) * m


# ---------------------------------------------------------------------------
# Fused kernel: (src @ W' , swap @ W') accumulated over k tiles (usually 1),
# then L2-normalize, img_dir = swap_n - src_n, loss[j] = 1 - img_dir[j].tbar
# ---------------------------------------------------------------------------
def _fused_loss_kernel(src_ref, swap_ref, w_ref, b_ref, tbar_ref, out_ref,
                       acc_src, acc_swap, *, tk):
    k = pl.program_id(1)

    @pl.when(k == 0)
    def _init():
        acc_src[...] = jnp.zeros_like(acc_src)
        acc_swap[...] = jnp.zeros_like(acc_swap)

    # Weight is VMEM-resident (constant block index). When the contraction is
    # not tiled (tk == F_pad) load it whole; otherwise slice the current chunk.
    if w_ref.shape[0] == tk:
        w = w_ref[...]                               # (tk, D) bf16
    else:
        off = pl.multiple_of(k * tk, tk)
        w = w_ref[pl.ds(off, tk), :]                 # (tk, D) bf16

    # bf16 LHS x bf16 RHS -> f32 accumulate on the MXU (one weight load feeds
    # both matmuls).
    acc_src[...] += jnp.dot(src_ref[...], w, preferred_element_type=jnp.float32)
    acc_swap[...] += jnp.dot(swap_ref[...], w, preferred_element_type=jnp.float32)

    @pl.when(k == pl.num_programs(1) - 1)
    def _finalize():
        b = b_ref[...]                               # (1, D) f32
        e_s = acc_src[...] + b                       # (tm, D) f32
        e_w = acc_swap[...] + b
        inv_s = jax.lax.rsqrt(jnp.sum(e_s * e_s, axis=-1, keepdims=True))
        inv_w = jax.lax.rsqrt(jnp.sum(e_w * e_w, axis=-1, keepdims=True))
        img_dir = e_w * inv_w - e_s * inv_s          # (tm, D)
        # tbar already carries logit_scale.exp() / (100 * n) / gender sum
        loss = 1.0 - jnp.sum(img_dir * tbar_ref[...], axis=-1, keepdims=True)
        out_ref[...] = jnp.broadcast_to(loss, out_ref.shape)   # lane-dense store


def fused_gender_swap_loss(src_flat, swap_flat, w_bf16, b_f32, tbar, *, tm, tk):
    n_pad, f_pad = src_flat.shape
    d = w_bf16.shape[1]
    grid = (n_pad // tm, f_pad // tk)
    kernel = functools.partial(_fused_loss_kernel, tk=tk)
    return pl.pallas_call(
        kernel,
        out_shape=jax.ShapeDtypeStruct((n_pad, OUT_LANES), jnp.float32),
        grid_spec=pltpu.PrefetchScalarGridSpec(
            num_scalar_prefetch=0,
            grid=grid,
            in_specs=[
                pl.BlockSpec((tm, tk), lambda i, k: (i, k)),     # src rows (bf16)
                pl.BlockSpec((tm, tk), lambda i, k: (i, k)),     # swap rows (bf16)
                pl.BlockSpec((f_pad, d), lambda i, k: (0, 0)),   # resident folded W
                pl.BlockSpec((1, d), lambda i, k: (0, 0)),       # folded bias (f32)
                pl.BlockSpec((1, d), lambda i, k: (0, 0)),       # scaled text dir
            ],
            out_specs=pl.BlockSpec((tm, OUT_LANES), lambda i, k: (i, 0)),
            scratch_shapes=[pltpu.VMEM((tm, d), jnp.float32),
                            pltpu.VMEM((tm, d), jnp.float32)],
        ),
        compiler_params=pltpu.CompilerParams(
            dimension_semantics=("parallel", "arbitrary"),
            vmem_limit_bytes=VMEM_BUDGET_BYTES),
    )(src_flat, swap_flat, w_bf16, b_f32, tbar)


# ---------------------------------------------------------------------------
# Module
# ---------------------------------------------------------------------------
class GenderSwapClipDirLoss:
    def __init__(self, female_male_target_texts, *, resolution=32, embed_dim=128,
                 key=None):
        assert len(female_male_target_texts) == 2
        if key is None:
            key = jax.random.PRNGKey(0)
        self.input_resolution = resolution
        self.embed_dim = embed_dim
        kw, kb, kt = jax.random.split(key, 3)
        feat = 3 * resolution * resolution
        self.feat = feat
        # deterministic synthetic "image encoder" weights (stand-in for ViT-B/32)
        self.w_img = jax.random.normal(kw, (feat, embed_dim), jnp.float32) / np.sqrt(feat)
        self.b_img = jax.random.normal(kb, (1, embed_dim), jnp.float32) * 0.01
        # deterministic synthetic text encodings for the two target texts
        text_enc = jax.random.normal(kt, (2, embed_dim), jnp.float32)
        text_enc = text_enc / jnp.linalg.norm(text_enc, axis=-1, keepdims=True)
        self.text_dirs = jnp.stack(
            [text_enc[0] - text_enc[1], text_enc[1] - text_enc[0]], axis=0)  # (2, D)
        # CLIP logit_scale parameter (init value log(1/0.07)); forward uses exp()
        self.logit_scale = jnp.float32(np.log(1.0 / 0.07))

        # Fold normalize_imgs (x -> ((x+1)/2 - mean)/std, channel-major flatten)
        # into the encoder GEMM:  x_norm @ W + b == x @ W' + b'
        hw = resolution * resolution
        mean = jnp.asarray(CLIP_MEAN, jnp.float32)
        std = jnp.asarray(CLIP_STD, jnp.float32)
        s_vec = jnp.repeat(0.5 / std, hw)                    # (F,) per-feature scale
        o_vec = jnp.repeat((0.5 - mean) / std, hw)           # (F,) per-feature offset
        w_folded = self.w_img * s_vec[:, None]
        b_folded = self.b_img + (o_vec @ self.w_img)[None, :]
        # Pad the feature axis to a multiple of 256 once (zero rows contribute
        # nothing) so all bf16 tiles stay (16,128)-aligned with no per-call pad.
        self.f_pad = _round_up(feat, 256)
        w_folded = jnp.pad(w_folded, ((0, self.f_pad - feat), (0, 0)))
        self.w_enc = w_folded.astype(jnp.bfloat16)           # bf16 for the MXU
        self.b_enc = b_folded.astype(jnp.float32)

    # ---- tile selection --------------------------------------------------
    def _pick_tm(self, n):
        n_pad0 = _round_up(max(n, 8), 8)
        tm = 8
        for c in (512, 256, 128, 64, 32, 16, 8):
            if c <= n_pad0:
                tm = c
                break
        # v7x megacore: prefer >= 2 row tiles so the "parallel" axis can shard
        # across both TensorCores (no effect on single-TC v5e/v6e).
        if n_pad0 >= 16 and (n_pad0 + tm - 1) // tm < 2:
            tm = max(8, tm // 2)
        n_pad = _round_up(n_pad0, tm)
        return tm, n_pad

    def _pick_tk(self, tm):
        d = self.embed_dim
        f_pad = self.f_pad
        fixed = (2 * f_pad * d * 2           # resident bf16 weight (worst case x2)
                 + 2 * tm * d * 4            # f32 accumulators
                 + 2 * tm * OUT_LANES * 4    # double-buffered output
                 + 4 * d * 4)                # bias + tbar
        budget = VMEM_BUDGET_BYTES - (4 << 20)   # headroom
        tk = f_pad
        while tk > 256:
            if f_pad % tk == 0 and fixed + 2 * 2 * tm * tk * 2 <= budget:
                return tk
            tk -= 256
        return 256

    # ---- forward ----------------------------------------------------------
    def __call__(self, src_imgs, swap_imgs, src_genders):
        r = self.input_resolution
        n = src_imgs.shape[0]
        feat = self.feat

        # resize_imgs (glue): bilinear resize in f32, emit bf16 so the
        # intermediate (N,3,R,R) round-trips HBM at half width.
        def resize_flat(x):
            y = jax.image.resize(x.astype(jnp.float32), (n, 3, r, r),
                                 method="bilinear")
            return y.astype(jnp.bfloat16).reshape(n, feat)

        src_flat = resize_flat(src_imgs)
        swap_flat = resize_flat(swap_imgs)

        # Gender-averaged text direction with logit_scale.exp()/100/n folded in.
        # Exactly equal to the per-sample PyTorch loop after the mean reduction.
        genders = jnp.reshape(src_genders, (n,)).astype(jnp.int32)
        onehot = jax.nn.one_hot(genders, 2, dtype=jnp.float32)        # (n, 2)
        counts = jnp.sum(onehot, axis=0)                              # (2,)
        scale = jnp.exp(self.logit_scale) / (100.0 * n)
        tbar = (scale * (counts @ self.text_dirs))[None, :]           # (1, D)

        # Row / contraction tiling.
        tm, n_pad = self._pick_tm(n)
        tk = self._pick_tk(tm)

        def pad(x):  # zero-pad rows + feature columns (stays bf16)
            return jnp.pad(x, ((0, n_pad - n), (0, self.f_pad - feat)))

        out = fused_gender_swap_loss(pad(src_flat), pad(swap_flat),
                                     self.w_enc, self.b_enc, tbar, tm=tm, tk=tk)
        return out[:n, :1]   # (n, 1), matches the PyTorch total_loss shape


# ---------------------------------------------------------------------------
# Pure-JAX reference (mirrors the PyTorch loop, un-folded f32 math)
# ---------------------------------------------------------------------------
def reference_forward(mod, src_imgs, swap_imgs, src_genders):
    r = mod.input_resolution
    n = src_imgs.shape[0]
    mean = jnp.asarray(CLIP_MEAN, jnp.float32).reshape(1, 3, 1, 1)
    std = jnp.asarray(CLIP_STD, jnp.float32).reshape(1, 3, 1, 1)

    def encode(x):
        x = jax.image.resize(x.astype(jnp.float32), (n, 3, r, r), method="bilinear")
        x = ((x + 1.0) / 2.0 - mean) / std
        e = x.reshape(n, -1) @ mod.w_img + mod.b_img
        return e / jnp.linalg.norm(e, axis=-1, keepdims=True)

    src_enc = encode(src_imgs)
    swap_enc = encode(swap_imgs)
    img_dir = swap_enc - src_enc
    g = np.asarray(src_genders).reshape(-1).astype(np.uint8)
    total = jnp.zeros((n, 1), jnp.float32)
    for i in range(n):
        tdir = mod.text_dirs[int(g[i])][None, :]
        loss_per_img = jnp.exp(mod.logit_scale) * (img_dir @ tdir.T)
        total = total + (1.0 - loss_per_img / 100.0)
    return total / n


if __name__ == "__main__":
    key = jax.random.PRNGKey(0)
    k1, k2, kmod = jax.random.split(key, 3)

    # small, module-consistent shapes (mixed genders + non-multiple-of-8 batch
    # exercise the tbar path and the row padding)
    src_imgs = jax.random.uniform(k1, (3, 3, 16, 16), jnp.float32, -1.0, 1.0)
    swap_imgs = jax.random.uniform(k2, (3, 3, 16, 16), jnp.float32, -1.0, 1.0)
    src_genders = jnp.array([0, 1, 1], dtype=jnp.int32)

    mod = GenderSwapClipDirLoss(["a photo of a woman", "a photo of a man"],
                                resolution=32, embed_dim=128, key=kmod)

    out = mod(src_imgs, swap_imgs, src_genders)
    out = jax.block_until_ready(out)

    ref = reference_forward(mod, src_imgs, swap_imgs, src_genders)
    np.testing.assert_allclose(np.asarray(out), np.asarray(ref), rtol=1e-2, atol=1e-2)

    print("KERNEL_OK")
</pallas_src>

<mosaic_0001>
module attributes {stable_mosaic.version = 11 : i64} {
  func.func @_fused_loss_kernel(%arg0: i32, %arg1: i32, %arg2: memref<8x3072xbf16, #tpu.memory_space<vmem>>, %arg3: memref<8x3072xbf16, #tpu.memory_space<vmem>>, %arg4: memref<3072x128xbf16, #tpu.memory_space<vmem>>, %arg5: memref<1x128xf32, #tpu.memory_space<vmem>>, %arg6: memref<1x128xf32, #tpu.memory_space<vmem>>, %arg7: memref<8x128xf32, #tpu.memory_space<vmem>>, %arg8: memref<8x128xf32, #tpu.memory_space<vmem>>, %arg9: memref<8x128xf32, #tpu.memory_space<vmem>>) attributes {dimension_semantics = [#tpu.dimension_semantics<parallel>, #tpu.dimension_semantics<arbitrary>], iteration_bounds = array<i64: 1, 1>, scalar_prefetch = 0 : i64, scratch_operands = 2 : i64, tpu.core_type = #tpu.core_type<tc>, window_params = [{transform_indices = @transform_0, window_bounds = array<i64: 8, 3072>}, {transform_indices = @transform_1, window_bounds = array<i64: 8, 3072>}, {pipeline_mode = #tpu.pipeline_mode<synchronous>, transform_indices = @transform_2, window_bounds = array<i64: 3072, 128>}, {pipeline_mode = #tpu.pipeline_mode<synchronous>, transform_indices = @transform_3, window_bounds = array<i64: 1, 128>}, {pipeline_mode = #tpu.pipeline_mode<synchronous>, transform_indices = @transform_4, window_bounds = array<i64: 1, 128>}, {transform_indices = @transform_5, window_bounds = array<i64: 8, 128>}]} {
    %c0_i32 = arith.constant 0 : i32
    %0 = arith.cmpi eq, %arg1, %c0_i32 : i32
    %1 = arith.extui %0 : i1 to i32
    %c0_i32_0 = arith.constant 0 : i32
    %2 = arith.cmpi ne, %1, %c0_i32_0 : i32
    scf.if %2 {
      %cst_17 = arith.constant 0.000000e+00 : f32
      %17 = vector.broadcast %cst_17 : f32 to vector<8x128xf32>
      %c0_18 = arith.constant 0 : index
      %c0_19 = arith.constant 0 : index
      %18 = vector.load %arg8[%c0_18, %c0_19] : memref<8x128xf32, #tpu.memory_space<vmem>>, vector<8x128xf32>
      tpu.vector_store %arg8[%c0_18, %c0_19], %17 {strides = array<i32>} : memref<8x128xf32, #tpu.memory_space<vmem>>, vector<8x128xf32>,
      %cst_20 = arith.constant 0.000000e+00 : f32
      %19 = vector.broadcast %cst_20 : f32 to vector<8x128xf32>
      %c0_21 = arith.constant 0 : index
      %c0_22 = arith.constant 0 : index
      %20 = vector.load %arg9[%c0_21, %c0_22] : memref<8x128xf32, #tpu.memory_space<vmem>>, vector<8x128xf32>
      tpu.vector_store %arg9[%c0_21, %c0_22], %19 {strides = array<i32>} : memref<8x128xf32, #tpu.memory_space<vmem>>, vector<8x128xf32>,
    } else {
    }
    %c0 = arith.constant 0 : index
    %c0_1 = arith.constant 0 : index
    %3 = vector.load %arg4[%c0, %c0_1] : memref<3072x128xbf16, #tpu.memory_space<vmem>>, vector<3072x128xbf16>
    %c0_2 = arith.constant 0 : index
    %c0_3 = arith.constant 0 : index
    %4 = vector.load %arg8[%c0_2, %c0_3] : memref<8x128xf32, #tpu.memory_space<vmem>>, vector<8x128xf32>
    %c0_4 = arith.constant 0 : index
    %c0_5 = arith.constant 0 : index
    %5 = vector.load %arg2[%c0_4, %c0_5] : memref<8x3072xbf16, #tpu.memory_space<vmem>>, vector<8x3072xbf16>
    %cst = arith.constant dense<0.000000e+00> : vector<8x128xf32>
    %6 = tpu.matmul %5, %3, %cst {dimension_numbers = #tpu.dot_dimension_numbers<[1], [0], [0], [1], [0, 0, 1, 1], [], []>} : vector<8x3072xbf16>, vector<3072x128xbf16>, vector<8x128xf32> -> vector<8x128xf32>
    %7 = arith.addf %4, %6 : vector<8x128xf32>
    %c0_6 = arith.constant 0 : index
    %c0_7 = arith.constant 0 : index
    %8 = vector.load %arg8[%c0_6, %c0_7] : memref<8x128xf32, #tpu.memory_space<vmem>>, vector<8x128xf32>
    tpu.vector_store %arg8[%c0_6, %c0_7], %7 {strides = array<i32>} : memref<8x128xf32, #tpu.memory_space<vmem>>, vector<8x128xf32>,
    %c0_8 = arith.constant 0 : index
    %c0_9 = arith.constant 0 : index
    %9 = vector.load %arg9[%c0_8, %c0_9] : memref<8x128xf32, #tpu.memory_space<vmem>>, vector<8x128xf32>
    %c0_10 = arith.constant 0 : index
    %c0_11 = arith.constant 0 : index
    %10 = vector.load %arg3[%c0_10, %c0_11] : memref<8x3072xbf16, #tpu.memory_space<vmem>>, vector<8x3072xbf16>
    %cst_12 = arith.constant dense<0.000000e+00> : vector<8x128xf32>
    %11 = tpu.matmul %10, %3, %cst_12 {dimension_numbers = #tpu.dot_dimension_numbers<[1], [0], [0], [1], [0, 0, 1, 1], [], []>} : vector<8x3072xbf16>, vector<3072x128xbf16>, vector<8x128xf32> -> vector<8x128xf32>
    %12 = arith.addf %9, %11 : vector<8x128xf32>
    %c0_13 = arith.constant 0 : index
    %c0_14 = arith.constant 0 : index
    %13 = vector.load %arg9[%c0_13, %c0_14] : memref<8x128xf32, #tpu.memory_space<vmem>>, vector<8x128xf32>
    tpu.vector_store %arg9[%c0_13, %c0_14], %12 {strides = array<i32>} : memref<8x128xf32, #tpu.memory_space<vmem>>, vector<8x128xf32>,
    %c0_i32_15 = arith.constant 0 : i32
    %14 = arith.cmpi eq, %arg1, %c0_i32_15 : i32
    %15 = arith.extui %14 : i1 to i32
    %c0_i32_16 = arith.constant 0 : i32
    %16 = arith.cmpi ne, %15, %c0_i32_16 : i32
    scf.if %16 {
      %c0_17 = arith.constant 0 : index
      %c0_18 = arith.constant 0 : index
      %17 = vector.load %arg5[%c0_17, %c0_18] : memref<1x128xf32, #tpu.memory_space<vmem>>, vector<1x128xf32>
      %c0_19 = arith.constant 0 : index
      %c0_20 = arith.constant 0 : index
      %18 = vector.load %arg8[%c0_19, %c0_20] : memref<8x128xf32, #tpu.memory_space<vmem>>, vector<8x128xf32>
      %19 = vector.broadcast %17 : vector<1x128xf32> to vector<8x128xf32>
      %20 = arith.addf %18, %19 : vector<8x128xf32>
      %c0_21 = arith.constant 0 : index
      %c0_22 = arith.constant 0 : index
      %21 = vector.load %arg9[%c0_21, %c0_22] : memref<8x128xf32, #tpu.memory_space<vmem>>, vector<8x128xf32>
      %22 = vector.broadcast %17 : vector<1x128xf32> to vector<8x128xf32>
      %23 = arith.addf %21, %22 : vector<8x128xf32>
      %24 = arith.mulf %20, %20 : vector<8x128xf32>
      %cst_23 = arith.constant dense<0.000000e+00> : vector<8xf32>
      %25 = vector.multi_reduction <add>, %24, %cst_23 [1] : vector<8x128xf32> to vector<8xf32>
      %26 = vector.shape_cast %25 : vector<8xf32> to vector<8x1xf32>
      %27 = math.rsqrt %26 : vector<8x1xf32>
      %28 = arith.mulf %23, %23 : vector<8x128xf32>
      %cst_24 = arith.constant dense<0.000000e+00> : vector<8xf32>
      %29 = vector.multi_reduction <add>, %28, %cst_24 [1] : vector<8x128xf32> to vector<8xf32>
      %30 = vector.shape_cast %29 : vector<8xf32> to vector<8x1xf32>
      %31 = math.rsqrt %30 : vector<8x1xf32>
      %32 = vector.broadcast %31 : vector<8x1xf32> to vector<8x128xf32>
      %33 = arith.mulf %23, %32 : vector<8x128xf32>
      %34 = vector.broadcast %27 : vector<8x1xf32> to vector<8x128xf32>
      %35 = arith.mulf %20, %34 : vector<8x128xf32>
      %36 = arith.subf %33, %35 : vector<8x128xf32>
      %c0_25 = arith.constant 0 : index
      %c0_26 = arith.constant 0 : index
      %37 = vector.load %arg6[%c0_25, %c0_26] : memref<1x128xf32, #tpu.memory_space<vmem>>, vector<1x128xf32>
      %38 = vector.broadcast %37 : vector<1x128xf32> to vector<8x128xf32>
      %39 = arith.mulf %36, %38 : vector<8x128xf32>
      %cst_27 = arith.constant dense<0.000000e+00> : vector<8xf32>
      %40 = vector.multi_reduction <add>, %39, %cst_27 [1] : vector<8x128xf32> to vector<8xf32>
      %41 = vector.shape_cast %40 : vector<8xf32> to vector<8x1xf32>
      %cst_28 = arith.constant 1.000000e+00 : f32
      %42 = vector.broadcast %cst_28 : f32 to vector<8x1xf32>
      %43 = arith.subf %42, %41 : vector<8x1xf32>
      %44 = vector.shape_cast %43 : vector<8x1xf32> to vector<8x1xf32>
      %45 = vector.broadcast %44 : vector<8x1xf32> to vector<8x128xf32>
      %c0_29 = arith.constant 0 : index
      %c0_30 = arith.constant 0 : index
      %46 = vector.load %arg7[%c0_29, %c0_30] : memref<8x128xf32, #tpu.memory_space<vmem>>, vector<8x128xf32>
      tpu.vector_store %arg7[%c0_29, %c0_30], %45 {strides = array<i32>} : memref<8x128xf32, #tpu.memory_space<vmem>>, vector<8x128xf32>,
    } else {
    }
    return
  }
  func.func @transform_0(%arg0: i32, %arg1: i32) -> (i32, i32) {
    %c0_i32 = arith.constant 0 : i32
    return %arg0, %arg1 : i32, i32
  }
  func.func @transform_1(%arg0: i32, %arg1: i32) -> (i32, i32) {
    %c0_i32 = arith.constant 0 : i32
    return %arg0, %arg1 : i32, i32
  }
  func.func @transform_2(%arg0: i32, %arg1: i32) -> (i32, i32) {
    %c0_i32 = arith.constant 0 : i32
    %c0_i32_0 = arith.constant 0 : i32
    %c0_i32_1 = arith.constant 0 : i32
    return %c0_i32, %c0_i32_0 : i32, i32
  }
  func.func @transform_3(%arg0: i32, %arg1: i32) -> (i32, i32) {
    %c0_i32 = arith.constant 0 : i32
    %c0_i32_0 = arith.constant 0 : i32
    %c0_i32_1 = arith.constant 0 : i32
    return %c0_i32, %c0_i32_0 : i32, i32
  }
  func.func @transform_4(%arg0: i32, %arg1: i32) -> (i32, i32) {
    %c0_i32 = arith.constant 0 : i32
    %c0_i32_0 = arith.constant 0 : i32
    %c0_i32_1 = arith.constant 0 : i32
    return %c0_i32, %c0_i32_0 : i32, i32
  }
  func.func @transform_5(%arg0: i32, %arg1: i32) -> (i32, i32) {
    %c0_i32 = arith.constant 0 : i32
    %c0_i32_0 = arith.constant 0 : i32
    return %arg0, %c0_i32 : i32, i32
  }
}

</mosaic_0001>

<bundles_post_ra>
// kernel: tpu_custom_call.1
= control target key start
LH: loop header
LB: loop body
LE: loop exit
PB: predicated region body
PF: predicated region fallthrough
CT: control target
= control target key end

     0   :  { %10 = vsyncpa [#allocation5], 0  ;;  %s4493_s0 = inlined_call_operand.hbm [shape: bf16[8,3072], index: 0, kind: input, shape index: {}]   ;;  %s4494_s1 = inlined_call_operand.hbm [shape: bf16[8,3072], index: 1, kind: input, shape index: {}]   ;;  %s4495_s2 = inlined_call_operand.hbm [shape: bf16[3072,128], index: 2, kind: input, shape index: {}]   ;;  %s4496_s3 = inlined_call_operand.vmem [shape: f32[1,128], index: 3, kind: input, shape index: {}]   ;;  %s4497_s4 = inlined_call_operand.vmem [shape: f32[1,128], index: 4, kind: input, shape index: {}]   ;;  %s4498_s5 = inlined_call_operand.hbm [shape: f32[8,128], index: 5, kind: output, shape index: {}]  }
   0x1   :  { %11 = vsyncpa [#allocation8], 0 }
   0x2   :  { %12 = vsyncpa [#allocation6], 0  ;;  %s4044_s18 = smov [#allocation7]   ;;  %s4045_s20 = smov [#allocation4]  }
   0x3   :  { %s29_s19 = sshll.u32 %s4044_s18, 4  ;;  %s19_s21 = sshll.u32 %s4045_s20, 4  ;;  %s30_s19 = int_to_ptr.vmem [resolvable:$true] %s29_s19  ;;  %s20_s21 = int_to_ptr.vmem [resolvable:$true] %s19_s21 }
   0x4   :  { %s3950_s24 = scalar_lea.hbm %s4494_s1, 1536 }
   0x5   :  { %p3951_p0 = scmp.ne.s32.totalorder %s4494_s1, %s3950_s24  ;;  %p3954_p1 = scmp.lt.u32.totalorder %s3950_s24, %s4494_s1 }
   0x7   :  { %p3956_p2 = pnand %p3954_p1, %p3951_p0 }
   0x9   :  { %3959 = shalt.err (!%p3956_p2)
}
   0xa   :  { %s3960_s29 = scalar_lea.vmem %s30_s19, 1536  ;;  %p3965_p4 = scmp.lt.s32.totalorder %s30_s19, %s30_s19 }
   0xb   :  { %p3961_p3 = scmp.ne.s32.totalorder %s30_s19, %s3960_s29  ;;  %p3966_p5 = scmp.lt.s32.totalorder %s3960_s29, %s3960_s29 }
   0xd   :  { %p3967_p6 = por %p3966_p5, %p3965_p4 }
   0xf   :  { %p3968_p7 = pnand %p3967_p6, %p3961_p3 }
  0x11   :  { %3971 = shalt.err (!%p3968_p7)
}
  0x12   :  { %32 = dma.hbm_to_vmem [thread:$0]  %s4494_s1, 1536, %s30_s19, [#allocation8]  }
  0x13   :  { %s3972_s9 = scalar_lea.hbm %s4493_s0, 1536 }
  0x14   :  { %p3973_p8 = scmp.ne.s32.totalorder %s4493_s0, %s3972_s9  ;;  %p3976_p9 = scmp.lt.u32.totalorder %s3972_s9, %s4493_s0 }
  0x16   :  { %p3978_p10 = pnand %p3976_p9, %p3973_p8 }
  0x18   :  { %3981 = shalt.err (!%p3978_p10)
}
  0x19   :  { %s3982_s14 = scalar_lea.vmem %s20_s21, 1536  ;;  %p3987_p12 = scmp.lt.s32.totalorder %s20_s21, %s20_s21 }
  0x1a   :  { %p3983_p11 = scmp.ne.s32.totalorder %s20_s21, %s3982_s14  ;;  %p3988_p13 = scmp.lt.s32.totalorder %s3982_s14, %s3982_s14 }
  0x1c   :  { %p3989_p0 = por %p3988_p13, %p3987_p12 }
  0x1e   :  { %p3990_p1 = pnand %p3989_p0, %p3983_p11 }
  0x20   :  { %3993 = shalt.err (!%p3990_p1)
}
  0x21   :  { %22 = dma.hbm_to_vmem [thread:$0]  %s4493_s0, 1536, %s20_s21, [#allocation5]  }
  0x22   :  { %s4046_s16 = smov [#allocation9]   ;;  %s3994_s20 = scalar_lea.hbm %s4495_s2, 24576 }
  0x23   :  { %s38_s17 = sshll.u32 %s4046_s16, 4  ;;  %p3995_p2 = scmp.ne.s32.totalorder %s4495_s2, %s3994_s20  ;;  %s39_s17 = int_to_ptr.vmem [resolvable:$true] %s38_s17 }
  0x24   :  { %p3998_p3 = scmp.lt.u32.totalorder %s3994_s20, %s4495_s2 }
  0x26   :  { %p4000_p4 = pnand %p3998_p3, %p3995_p2 }
  0x28   :  { %4003 = shalt.err (!%p4000_p4)
}
  0x29   :  { %s4004_s26 = scalar_lea.vmem %s39_s17, 24576  ;;  %p4009_p6 = scmp.lt.s32.totalorder %s39_s17, %s39_s17 }
  0x2a   :  { %p4005_p5 = scmp.ne.s32.totalorder %s39_s17, %s4004_s26  ;;  %p4010_p7 = scmp.lt.s32.totalorder %s4004_s26, %s4004_s26 }
  0x2c   :  { %p4011_p8 = por %p4010_p7, %p4009_p6 }
  0x2e   :  { %p4012_p9 = pnand %p4011_p8, %p4005_p5 }
  0x30   :  { %4015 = shalt.err (!%p4012_p9)
}
  0x31   :  { %s4047_s0 = smov 64   ;;  %s4048_s21 = smov 4  }
  0x32   :  { %44 = dma.hbm_to_vmem [thread:$0]  %s4495_s2, 24576, %s39_s17, [#allocation8], %s4047_s0, %s4047_s0, %s4048_s21  }
  0x33   :  { %4038 = dma.done.wait [#allocation5], 1536  }
  0x34   :  { %4039 = vsyncadd [#allocation5], 4294965760 }
  0x35   :  { %4040 = dma.done.wait [#allocation8], 26112  }
  0x36   :  { %4041 = vsyncadd [#allocation8], 4294941184  ;;  %v3588_v0 = vld [vmem:[#allocation9 + $0x40] sm:$0xff]   ;;  %v3592_v4 = vld [vmem:[#allocation9 + $0x48] sm:$0xff]   ;;  %s4049_s6 = smov [#allocation10]  }
  0x37   :  { %v3589_v1 = vld [vmem:[#allocation9 + $0xc0] sm:$0xff]   ;;  %3054 = vmatprep.subr.bf16.mxu0 %v3588_v0  ;;  %v3593_v5 = vld [vmem:[#allocation9 + $0xc8] sm:$0xff]   ;;  %v3596_v8 = vld [vmem:[#allocation9 + $0x50] sm:$0xff]   ;;  %s2802_s7 = sshll.u32 %s4049_s6, 4  ;;  %s2803_s7 = int_to_ptr.vmem [resolvable:$true] %s2802_s7 }
  0x38   :  { %v3590_v2 = vld [vmem:[#allocation9] sm:$0xff]   ;;  %3076 = vmatprep.subr.bf16.mxu1 %v3589_v1  ;;  %v3594_v6 = vld [vmem:[#allocation9 + $0x8] sm:$0xff]   ;;  %v3597_v9 = vld [vmem:[#allocation9 + $0xd0] sm:$0xff]   ;;  %s4016_s8 = scalar_lea.vmem %s2803_s7, 128  ;;  %p4021_p11 = scmp.lt.s32.totalorder %s2803_s7, %s2803_s7 }
  0x39   :  { %v3591_v3 = vld [vmem:[#allocation9 + $0x80] sm:$0xff]   ;;  %3055 = vmatpush3.bf16.msra.mxu0 %v3590_v2  ;;  %v3595_v7 = vld [vmem:[#allocation9 + $0x88] sm:$0xff]   ;;  %v3598_v10 = vld [vmem:[#allocation9 + $0x10] sm:$0xff]   ;;  %p4017_p10 = scmp.ne.s32.totalorder %s2803_s7, %s4016_s8  ;;  %p4022_p12 = scmp.lt.s32.totalorder %s4016_s8, %s4016_s8 }
  0x3a   :  { %3077 = vmatpush3.bf16.msra.mxu1 %v3591_v3  ;;  %3056 = vmatprep.subr.bf16.mxu0 %v3592_v4  ;;  %v3599_v11 = vld [vmem:[#allocation9 + $0x90] sm:$0xff]   ;;  %v3600_v12 = vld [vmem:[#allocation9 + $0x58] sm:$0xff]   ;;  %v3604_v16 = vld [vmem:[#allocation9 + $0x60] sm:$0xff]  }
  0x3b   :  { %3078 = vmatprep.subr.bf16.mxu1 %v3593_v5  ;;  %v3601_v13 = vld [vmem:[#allocation9 + $0xd8] sm:$0xff]   ;;  %v3605_v17 = vld [vmem:[#allocation9 + $0xe0] sm:$0xff]   ;;  %v3608_v20 = vld [vmem:[#allocation9 + $0x68] sm:$0xff]   ;;  %p4023_p13 = por %p4022_p12, %p4021_p11 }
  0x3c   :  { %v3602_v14 = vld [vmem:[#allocation9 + $0x18] sm:$0xff]   ;;  %v3606_v18 = vld [vmem:[#allocation9 + $0x20] sm:$0xff]   ;;  %v3609_v21 = vld [vmem:[#allocation9 + $0xe8] sm:$0xff]  }
  0x3d   :  { %3057 = vmatpush3.bf16.msra.mxu0 %v3594_v6  ;;  %v3603_v15 = vld [vmem:[#allocation9 + $0x98] sm:$0xff]   ;;  %v3607_v19 = vld [vmem:[#allocation9 + $0xa0] sm:$0xff]   ;;  %v3610_v22 = vld [vmem:[#allocation9 + $0x28] sm:$0xff]   ;;  %p4024_p0 = pnand %p4023_p13, %p4017_p10 }
  0x3e   :  { %3079 = vmatpush3.bf16.msra.mxu1 %v3595_v7  ;;  %3058 = vmatprep.subr.bf16.mxu0 %v3596_v8  ;;  %v3611_v23 = vld [vmem:[#allocation9 + $0xa8] sm:$0xff]   ;;  %v3612_v24 = vld [vmem:[#allocation9 + $0x70] sm:$0xff]   ;;  %v3616_v28 = vld [vmem:[#allocation9 + $0x78] sm:$0xff]  }
  0x3f   :  { %3080 = vmatprep.subr.bf16.mxu1 %v3597_v9  ;;  %v3613_v25 = vld [vmem:[#allocation9 + $0xf0] sm:$0xff]   ;;  %v3617_v29 = vld [vmem:[#allocation9 + $0xf8] sm:$0xff]   ;;  %v450_v32 = vld [vmem:[#allocation4] sm:$0xff] }
  0x40   :  { %v3614_v26 = vld [vmem:[#allocation9 + $0x30] sm:$0xff]   ;;  %v3618_v30 = vld [vmem:[#allocation9 + $0x38] sm:$0xff]   ;;  %v451_v33 = vld [vmem:[#allocation4 + $0x8] sm:$0xff]  ;;  %v2812_v34 = vcombine.low %v450_v32, %v450_v32  ;;  %v2813_v35 = vcombine.high %v450_v32, %v450_v32 }
  0x41   :  { %3059 = vmatpush3.bf16.msra.mxu0 %v3598_v10  ;;  %v3615_v27 = vld [vmem:[#allocation9 + $0xb0] sm:$0xff]   ;;  %v3619_v31 = vld [vmem:[#allocation9 + $0xb8] sm:$0xff]   ;;  %v2814_v36 = vcombine.low %v451_v33, %v451_v33  ;;  %v2815_v37 = vcombine.high %v451_v33, %v451_v33  ;;  %v3624_v38 = vld [vmem:[#allocation9 + $0x140] sm:$0xff]  }
  0x42   :  { %3081 = vmatpush3.bf16.msra.mxu1 %v3599_v11  ;;  %3060 = vmatprep.subr.bf16.mxu0 %v3600_v12  ;;  %v3625_v39 = vld [vmem:[#allocation9 + $0x1c0] sm:$0xff]   ;;  %v3628_v42 = vld [vmem:[#allocation9 + $0x148] sm:$0xff]   ;;  %v3632_v46 = vld [vmem:[#allocation9 + $0x150] sm:$0xff]  }
  0x43   :  { %3082 = vmatprep.subr.bf16.mxu1 %v3601_v13  ;;  %1730 = vmatprep.mubr.bf16.mxu0 %v2813_v35  ;;  %v3626_v40 = vld [vmem:[#allocation9 + $0x100] sm:$0xff]   ;;  %v3629_v43 = vld [vmem:[#allocation9 + $0x1c8] sm:$0xff]   ;;  %v3633_v47 = vld [vmem:[#allocation9 + $0x1d0] sm:$0xff]  }
  0x44   :  { %1770 = vmatprep.mubr.bf16.mxu1 %v2815_v37  ;;  %v3627_v41 = vld [vmem:[#allocation9 + $0x180] sm:$0xff]   ;;  %v3630_v44 = vld [vmem:[#allocation9 + $0x108] sm:$0xff]   ;;  %v3634_v48 = vld [vmem:[#allocation9 + $0x110] sm:$0xff]  }
  0x45   :  { %3061 = vmatpush3.bf16.msra.mxu0 %v3602_v14  ;;  %v3631_v45 = vld [vmem:[#allocation9 + $0x188] sm:$0xff]   ;;  %v3635_v49 = vld [vmem:[#allocation9 + $0x190] sm:$0xff]   ;;  %v3636_v50 = vld [vmem:[#allocation9 + $0x158] sm:$0xff]  }
  0x46   :  { %3083 = vmatpush3.bf16.msra.mxu1 %v3603_v15  ;;  %3062 = vmatprep.subr.bf16.mxu0 %v3604_v16  ;;  %v3637_v51 = vld [vmem:[#allocation9 + $0x1d8] sm:$0xff]   ;;  %v3640_v54 = vld [vmem:[#allocation9 + $0x160] sm:$0xff]   ;;  %v3644_v58 = vld [vmem:[#allocation9 + $0x168] sm:$0xff]  }
  0x47   :  { %3084 = vmatprep.subr.bf16.mxu1 %v3605_v17  ;;  %v3638_v52 = vld [vmem:[#allocation9 + $0x118] sm:$0xff]   ;;  %v3641_v55 = vld [vmem:[#allocation9 + $0x1e0] sm:$0xff]   ;;  %v3645_v59 = vld [vmem:[#allocation9 + $0x1e8] sm:$0xff]  }
  0x48   :  { %v3639_v53 = vld [vmem:[#allocation9 + $0x198] sm:$0xff]   ;;  %v3642_v56 = vld [vmem:[#allocation9 + $0x120] sm:$0xff]   ;;  %v3646_v60 = vld [vmem:[#allocation9 + $0x128] sm:$0xff]  }
  0x49   :  { %3063 = vmatpush3.bf16.msra.mxu0 %v3606_v18  ;;  %v3643_v57 = vld [vmem:[#allocation9 + $0x1a0] sm:$0xff]   ;;  %v3647_v61 = vld [vmem:[#allocation9 + $0x1a8] sm:$0xff]   ;;  %v3648_v62 = vld [vmem:[#allocation9 + $0x170] sm:$0xff]  }
  0x4a   :  { %3085 = vmatpush3.bf16.msra.mxu1 %v3607_v19  ;;  %3064 = vmatprep.subr.bf16.mxu0 %v3608_v20  ;;  %v3649_v63 = vld [vmem:[#allocation9 + $0x1f0] sm:$0xff]   ;;  %v3652_v2 = vld [vmem:[#allocation9 + $0x178] sm:$0xff]   ;;  %v3660_v12 = vld [vmem:[#allocation9 + $0x240] sm:$0xff]  }
  0x4b   :  { %3086 = vmatprep.subr.bf16.mxu1 %v3609_v21  ;;  %v3650_v0 = vld [vmem:[#allocation9 + $0x130] sm:$0xff]   ;;  %v3653_v3 = vld [vmem:[#allocation9 + $0x1f8] sm:$0xff]   ;;  %v3661_v13 = vld [vmem:[#allocation9 + $0x2c0] sm:$0xff]  }
  0x4c   :  { %v3651_v1 = vld [vmem:[#allocation9 + $0x1b0] sm:$0xff]   ;;  %v3654_v4 = vld [vmem:[#allocation9 + $0x138] sm:$0xff]   ;;  %v3662_v14 = vld [vmem:[#allocation9 + $0x200] sm:$0xff]  }
  0x4d   :  { %3065 = vmatpush3.bf16.msra.mxu0 %v3610_v22  ;;  %v3655_v5 = vld [vmem:[#allocation9 + $0x1b8] sm:$0xff]   ;;  %v452_v6 = vld [vmem:[#allocation4 + $0x10] sm:$0xff]  ;;  %v3663_v15 = vld [vmem:[#allocation9 + $0x280] sm:$0xff]  }
  0x4e   :  { %3087 = vmatpush3.bf16.msra.mxu1 %v3611_v23  ;;  %3066 = vmatprep.subr.bf16.mxu0 %v3612_v24  ;;  %v2816_v7 = vcombine.low %v452_v6, %v452_v6  ;;  %v2817_v8 = vcombine.high %v452_v6, %v452_v6  ;;  %v453_v9 = vld [vmem:[#allocation4 + $0x18] sm:$0xff]  ;;  %v3664_v16 = vld [vmem:[#allocation9 + $0x248] sm:$0xff]   ;;  %v3668_v20 = vld [vmem:[#allocation9 + $0x250] sm:$0xff]  }
  0x4f   :  { %3088 = vmatprep.subr.bf16.mxu1 %v3613_v25  ;;  %v2818_v10 = vcombine.low %v453_v9, %v453_v9  ;;  %v2819_v11 = vcombine.high %v453_v9, %v453_v9  ;;  %v3665_v17 = vld [vmem:[#allocation9 + $0x2c8] sm:$0xff]   ;;  %v3669_v21 = vld [vmem:[#allocation9 + $0x2d0] sm:$0xff]   ;;  %v3672_v24 = vld [vmem:[#allocation9 + $0x258] sm:$0xff]  }
  0x50   :  { %v3666_v18 = vld [vmem:[#allocation9 + $0x208] sm:$0xff]   ;;  %v3670_v22 = vld [vmem:[#allocation9 + $0x210] sm:$0xff]   ;;  %v3673_v25 = vld [vmem:[#allocation9 + $0x2d8] sm:$0xff]  }
  0x51   :  { %3067 = vmatpush3.bf16.msra.mxu0 %v3614_v26  ;;  %v3667_v19 = vld [vmem:[#allocation9 + $0x288] sm:$0xff]   ;;  %v3671_v23 = vld [vmem:[#allocation9 + $0x290] sm:$0xff]   ;;  %v3674_v26 = vld [vmem:[#allocation9 + $0x218] sm:$0xff]  }
  0x52   :  { %3089 = vmatpush3.bf16.msra.mxu1 %v3615_v27  ;;  %3068 = vmatprep.subr.bf16.mxu0 %v3616_v28  ;;  %v3675_v27 = vld [vmem:[#allocation9 + $0x298] sm:$0xff]   ;;  %v3676_v28 = vld [vmem:[#allocation9 + $0x260] sm:$0xff]   ;;  %v3680_v32 = vld [vmem:[#allocation9 + $0x268] sm:$0xff]  }
  0x53   :  { %3090 = vmatprep.subr.bf16.mxu1 %v3617_v29  ;;  %v3677_v29 = vld [vmem:[#allocation9 + $0x2e0] sm:$0xff]   ;;  %v3681_v33 = vld [vmem:[#allocation9 + $0x2e8] sm:$0xff]   ;;  %v3685_v37 = vld [vmem:[#allocation9 + $0x2f0] sm:$0xff]  }
  0x54   :  { %v3683_v35 = vld [vmem:[#allocation9 + $0x2a8] sm:$0xff]  }
  0x55   :  { %3069 = vmatpush3.bf16.msra.mxu0 %v3618_v30  ;;  %v3678_v30 = vld [vmem:[#allocation9 + $0x220] sm:$0xff]   ;;  %v3716_v6 = vld [vmem:[#allocation9 + $0x368] sm:$0xff]  }
  0x56   :  { %3091 = vmatpush3.bf16.msra.mxu1 %v3619_v31  ;;  %3098 = vmatprep.subr.bf16.mxu0 %v3624_v38  ;;  %v3679_v31 = vld [vmem:[#allocation9 + $0x2a0] sm:$0xff]   ;;  %v3686_v38 = vld [vmem:[#allocation9 + $0x230] sm:$0xff]   ;;  %v4119_v9 = vld [vmem:[#allocation9 + $0x3a8] sm:$0xff]  }
  0x57   :  { %3120 = vmatprep.subr.bf16.mxu1 %v3625_v39  ;;  %v3687_v39 = vld [vmem:[#allocation9 + $0x2b0] sm:$0xff]  }
  0x58   :  { %1731 = vmatmul.mubr.bf16.vlgmr.msra.gmra.mrb[0].mxu0 %v2812_v34  ;;  %v3682_v34 = vld [vmem:[#allocation9 + $0x228] sm:$0xff]  }
  0x59   :  { %1771 = vmatmul.mubr.bf16.vlgmr.msra.gmra.mrb[0].mxu1 %v2814_v36  ;;  %3099 = vmatpush3.bf16.msra.mxu0 %v3626_v40  ;;  %v3684_v36 = vld [vmem:[#allocation9 + $0x270] sm:$0xff]   ;;  %v3688_v40 = vld [vmem:[#allocation9 + $0x278] sm:$0xff]  }
  0x5a   :  { %3121 = vmatpush3.bf16.msra.mxu1 %v3627_v41  ;;  %3100 = vmatprep.subr.bf16.mxu0 %v3628_v42  ;;  %v3689_v41 = vld [vmem:[#allocation9 + $0x2f8] sm:$0xff]  }
  0x5b   :  { %3122 = vmatprep.subr.bf16.mxu1 %v3629_v43  ;;  %1810 = vmatprep.mubr.bf16.mxu0 %v2817_v8  ;;  %v3690_v42 = vld [vmem:[#allocation9 + $0x238] sm:$0xff]   ;;  %v3718_v8 = vld [vmem:[#allocation9 + $0x328] sm:$0xff]  }
  0x5c   :  { %1850 = vmatprep.mubr.bf16.mxu1 %v2819_v11  ;;  %v3691_v43 = vld [vmem:[#allocation9 + $0x2b8] sm:$0xff]   ;;  %v4124_v11 = vld [vmem:[#allocation9 + $0x3f0] sm:$0xff]  }
  0x5d   :  { %3101 = vmatpush3.bf16.msra.mxu0 %v3630_v44  ;;  %v454_v44 = vld [vmem:[#allocation4 + $0x20] sm:$0xff] }
  0x5e   :  { %3123 = vmatpush3.bf16.msra.mxu1 %v3631_v45  ;;  %3102 = vmatprep.subr.bf16.mxu0 %v3632_v46  ;;  %v455_v45 = vld [vmem:[#allocation4 + $0x28] sm:$0xff]  ;;  %v2820_v46 = vcombine.low %v454_v44, %v454_v44 }
  0x5f   :  { %3124 = vmatprep.subr.bf16.mxu1 %v3633_v47  ;;  %v2821_v47 = vcombine.high %v454_v44, %v454_v44  ;;  %v4204_v44 = vld [vmem:[#allocation9 + $0x468] sm:$0xff]  }
  0x61   :  { %3103 = vmatpush3.bf16.msra.mxu0 %v3634_v48  ;;  %v2822_v48 = vcombine.low %v455_v45, %v455_v45 }
  0x62   :  { %3125 = vmatpush3.bf16.msra.mxu1 %v3635_v49  ;;  %3104 = vmatprep.subr.bf16.mxu0 %v3636_v50  ;;  %v2823_v49 = vcombine.high %v455_v45, %v455_v45  ;;  %v3696_v50 = vld [vmem:[#allocation9 + $0x340] sm:$0xff]   ;;  %v4208_v45 = vld [vmem:[#allocation9 + $0x4e8] sm:$0xff]  }
  0x63   :  { %3126 = vmatprep.subr.bf16.mxu1 %v3637_v51  ;;  %v3697_v51 = vld [vmem:[#allocation9 + $0x3c0] sm:$0xff]  }
  0x65   :  { %3105 = vmatpush3.bf16.msra.mxu0 %v3638_v52  ;;  %v3698_v52 = vld [vmem:[#allocation9 + $0x300] sm:$0xff]  }
  0x66   :  { %3127 = vmatpush3.bf16.msra.mxu1 %v3639_v53  ;;  %3106 = vmatprep.subr.bf16.mxu0 %v3640_v54  ;;  %v3699_v53 = vld [vmem:[#allocation9 + $0x380] sm:$0xff]   ;;  %v3700_v54 = vld [vmem:[#allocation9 + $0x348] sm:$0xff]  }
  0x67   :  { %3128 = vmatprep.subr.bf16.mxu1 %v3641_v55  ;;  %v3701_v55 = vld [vmem:[#allocation9 + $0x3c8] sm:$0xff]  }
  0x69   :  { %3107 = vmatpush3.bf16.msra.mxu0 %v3642_v56  ;;  %v3702_v56 = vld [vmem:[#allocation9 + $0x308] sm:$0xff]  }
  0x6a   :  { %3129 = vmatpush3.bf16.msra.mxu1 %v3643_v57  ;;  %3108 = vmatprep.subr.bf16.mxu0 %v3644_v58  ;;  %v3703_v57 = vld [vmem:[#allocation9 + $0x388] sm:$0xff]   ;;  %v3704_v58 = vld [vmem:[#allocation9 + $0x350] sm:$0xff]  }
  0x6b   :  { %3130 = vmatprep.subr.bf16.mxu1 %v3645_v59  ;;  %v3705_v59 = vld [vmem:[#allocation9 + $0x3d0] sm:$0xff]  }
  0x6d   :  { %3109 = vmatpush3.bf16.msra.mxu0 %v3646_v60  ;;  %v3706_v60 = vld [vmem:[#allocation9 + $0x310] sm:$0xff]  }
  0x6e   :  { %3131 = vmatpush3.bf16.msra.mxu1 %v3647_v61  ;;  %3110 = vmatprep.subr.bf16.mxu0 %v3648_v62  ;;  %v3707_v61 = vld [vmem:[#allocation9 + $0x390] sm:$0xff]   ;;  %v3708_v62 = vld [vmem:[#allocation9 + $0x358] sm:$0xff]  }
  0x6f   :  { %3132 = vmatprep.subr.bf16.mxu1 %v3649_v63  ;;  %v3709_v63 = vld [vmem:[#allocation9 + $0x3d8] sm:$0xff]  }
  0x71   :  { %3111 = vmatpush3.bf16.msra.mxu0 %v3650_v0  ;;  %v3710_v0 = vld [vmem:[#allocation9 + $0x318] sm:$0xff]  }
  0x72   :  { %3133 = vmatpush3.bf16.msra.mxu1 %v3651_v1  ;;  %3112 = vmatprep.subr.bf16.mxu0 %v3652_v2  ;;  %v3711_v1 = vld [vmem:[#allocation9 + $0x398] sm:$0xff]   ;;  %v3712_v2 = vld [vmem:[#allocation9 + $0x360] sm:$0xff]  }
  0x73   :  { %3134 = vmatprep.subr.bf16.mxu1 %v3653_v3  ;;  %v3713_v3 = vld [vmem:[#allocation9 + $0x3e0] sm:$0xff]  }
  0x75   :  { %3113 = vmatpush3.bf16.msra.mxu0 %v3654_v4  ;;  %v3714_v4 = vld [vmem:[#allocation9 + $0x320] sm:$0xff]  }
  0x76   :  { %3135 = vmatpush3.bf16.msra.mxu1 %v3655_v5  ;;  %3142 = vmatprep.subr.bf16.mxu0 %v3660_v12  ;;  %v3715_v5 = vld [vmem:[#allocation9 + $0x3a0] sm:$0xff]   ;;  %v4127_v12 = vld [vmem:[#allocation9 + $0x330] sm:$0xff]  }
  0x77   :  { %3164 = vmatprep.subr.bf16.mxu1 %v3661_v13  ;;  %v4130_v13 = vld [vmem:[#allocation9 + $0x3b0] sm:$0xff]  }
  0x78   :  { %1811 = vmatmul.mubr.bf16.vlgmr.msra.gmra.mrb[4].mxu0 %v2816_v7  ;;  %v4116_v7 = vld [vmem:[#allocation9 + $0x3e8] sm:$0xff]  }
  0x79   :  { %1851 = vmatmul.mubr.bf16.vlgmr.msra.gmra.mrb[4].mxu1 %v2818_v10  ;;  %3143 = vmatpush3.bf16.msra.mxu0 %v3662_v14  ;;  %v4121_v10 = vld [vmem:[#allocation9 + $0x370] sm:$0xff]   ;;  %v4132_v14 = vld [vmem:[#allocation9 + $0x378] sm:$0xff]  }
  0x7a   :  { %3165 = vmatpush3.bf16.msra.mxu1 %v3663_v15  ;;  %3144 = vmatprep.subr.bf16.mxu0 %v3664_v16  ;;  %v4136_v15 = vld [vmem:[#allocation9 + $0x3f8] sm:$0xff]  }
  0x7b   :  { %3166 = vmatprep.subr.bf16.mxu1 %v3665_v17  ;;  %1890 = vmatprep.mubr.bf16.mxu0 %v2821_v47  ;;  %v4139_v16 = vld [vmem:[#allocation9 + $0x338] sm:$0xff]   ;;  %v4214_v47 = vld [vmem:[#allocation9 + $0x4a8] sm:$0xff]  }
  0x7c   :  { %1930 = vmatprep.mubr.bf16.mxu1 %v2823_v49  ;;  %v4142_v17 = vld [vmem:[#allocation9 + $0x3b8] sm:$0xff]   ;;  %v4220_v49 = vld [vmem:[#allocation9 + $0x4f0] sm:$0xff]  }
  0x7d   :  { %3145 = vmatpush3.bf16.msra.mxu0 %v3666_v18  ;;  %v456_v18 = vld [vmem:[#allocation4 + $0x30] sm:$0xff] }
  0x7e   :  { %3167 = vmatpush3.bf16.msra.mxu1 %v3667_v19  ;;  %3146 = vmatprep.subr.bf16.mxu0 %v3668_v20  ;;  %v457_v19 = vld [vmem:[#allocation4 + $0x38] sm:$0xff]  ;;  %v2824_v20 = vcombine.low %v456_v18, %v456_v18 }
  0x7f   :  { %3168 = vmatprep.subr.bf16.mxu1 %v3669_v21  ;;  %v2825_v21 = vcombine.high %v456_v18, %v456_v18  ;;  %v4271_v18 = vld [vmem:[#allocation9 + $0x510] sm:$0xff]  }
  0x80   :  { %4539 = vst [vmem:[#allocation23_spill] sm:$0xff] %v4271_v18 }
  0x81   :  { %3147 = vmatpush3.bf16.msra.mxu0 %v3670_v22  ;;  %v2826_v22 = vcombine.low %v457_v19, %v457_v19 }
  0x82   :  { %3169 = vmatpush3.bf16.msra.mxu1 %v3671_v23  ;;  %3148 = vmatprep.subr.bf16.mxu0 %v3672_v24  ;;  %v4146_v23 = vld [vmem:[#allocation9 + $0x440] sm:$0xff]   ;;  %v2827_v24 = vcombine.high %v457_v19, %v457_v19  ;;  %v4274_v19 = vld [vmem:[#allocation9 + $0x590] sm:$0xff]  }
  0x83   :  { %3170 = vmatprep.subr.bf16.mxu1 %v3673_v25  ;;  %v4148_v25 = vld [vmem:[#allocation9 + $0x4c0] sm:$0xff]   ;;  %4540 = vst [vmem:[#allocation24_spill] sm:$0xff] %v4274_v19 }
  0x85   :  { %3149 = vmatpush3.bf16.msra.mxu0 %v3674_v26  ;;  %v4151_v26 = vld [vmem:[#allocation9 + $0x400] sm:$0xff]  }
  0x86   :  { %3171 = vmatpush3.bf16.msra.mxu1 %v3675_v27  ;;  %3150 = vmatprep.subr.bf16.mxu0 %v3676_v28  ;;  %v4153_v27 = vld [vmem:[#allocation9 + $0x480] sm:$0xff]   ;;  %v4156_v28 = vld [vmem:[#allocation9 + $0x448] sm:$0xff]  }
  0x87   :  { %3172 = vmatprep.subr.bf16.mxu1 %v3677_v29  ;;  %v4160_v29 = vld [vmem:[#allocation9 + $0x4c8] sm:$0xff]  }
  0x89   :  { %3151 = vmatpush3.bf16.msra.mxu0 %v3678_v30  ;;  %v4163_v30 = vld [vmem:[#allocation9 + $0x408] sm:$0xff]  }
  0x8a   :  { %3173 = vmatpush3.bf16.msra.mxu1 %v3679_v31  ;;  %3152 = vmatprep.subr.bf16.mxu0 %v3680_v32  ;;  %v4166_v31 = vld [vmem:[#allocation9 + $0x488] sm:$0xff]   ;;  %v4168_v32 = vld [vmem:[#allocation9 + $0x450] sm:$0xff]  }
  0x8b   :  { %3174 = vmatprep.subr.bf16.mxu1 %v3681_v33  ;;  %v4172_v33 = vld [vmem:[#allocation9 + $0x4d0] sm:$0xff]  }
  0x8d   :  { %3153 = vmatpush3.bf16.msra.mxu0 %v3682_v34  ;;  %v4175_v34 = vld [vmem:[#allocation9 + $0x410] sm:$0xff]  }
  0x8e   :  { %3175 = vmatpush3.bf16.msra.mxu1 %v3683_v35  ;;  %3154 = vmatprep.subr.bf16.mxu0 %v3684_v36  ;;  %v4178_v35 = vld [vmem:[#allocation9 + $0x490] sm:$0xff]   ;;  %v4180_v36 = vld [vmem:[#allocation9 + $0x458] sm:$0xff]  }
  0x8f   :  { %3176 = vmatprep.subr.bf16.mxu1 %v3685_v37  ;;  %v4184_v37 = vld [vmem:[#allocation9 + $0x4d8] sm:$0xff]  }
  0x91   :  { %3155 = vmatpush3.bf16.msra.mxu0 %v3686_v38  ;;  %v4187_v38 = vld [vmem:[#allocation9 + $0x418] sm:$0xff]  }
  0x92   :  { %3177 = vmatpush3.bf16.msra.mxu1 %v3687_v39  ;;  %3156 = vmatprep.subr.bf16.mxu0 %v3688_v40  ;;  %v4190_v39 = vld [vmem:[#allocation9 + $0x498] sm:$0xff]   ;;  %v4192_v40 = vld [vmem:[#allocation9 + $0x460] sm:$0xff]  }
  0x93   :  { %3178 = vmatprep.subr.bf16.mxu1 %v3689_v41  ;;  %v4196_v41 = vld [vmem:[#allocation9 + $0x4e0] sm:$0xff]  }
  0x95   :  { %3157 = vmatpush3.bf16.msra.mxu0 %v3690_v42  ;;  %v4199_v42 = vld [vmem:[#allocation9 + $0x420] sm:$0xff]  }
  0x96   :  { %3179 = vmatpush3.bf16.msra.mxu1 %v3691_v43  ;;  %3186 = vmatprep.subr.bf16.mxu0 %v3696_v50  ;;  %v4202_v43 = vld [vmem:[#allocation9 + $0x4a0] sm:$0xff]   ;;  %v4223_v50 = vld [vmem:[#allocation9 + $0x430] sm:$0xff]  }
  0x97   :  { %3208 = vmatprep.subr.bf16.mxu1 %v3697_v51  ;;  %v4226_v51 = vld [vmem:[#allocation9 + $0x4b0] sm:$0xff]  }
  0x98   :  { %1891 = vmatmul.mubr.bf16.vlgmr.msra.gmra.mrb[8].mxu0 %v2820_v46  ;;  %v4211_v46 = vld [vmem:[#allocation9 + $0x428] sm:$0xff]  }
  0x99   :  { %1931 = vmatmul.mubr.bf16.vlgmr.msra.gmra.mrb[8].mxu1 %v2822_v48  ;;  %3187 = vmatpush3.bf16.msra.mxu0 %v3698_v52  ;;  %v4216_v48 = vld [vmem:[#allocation9 + $0x470] sm:$0xff]   ;;  %v4228_v52 = vld [vmem:[#allocation9 + $0x478] sm:$0xff]  }
  0x9a   :  { %3209 = vmatpush3.bf16.msra.mxu1 %v3699_v53  ;;  %3188 = vmatprep.subr.bf16.mxu0 %v3700_v54  ;;  %v4232_v53 = vld [vmem:[#allocation9 + $0x4f8] sm:$0xff]  }
  0x9b   :  { %3210 = vmatprep.subr.bf16.mxu1 %v3701_v55  ;;  %1970 = vmatprep.mubr.bf16.mxu0 %v2825_v21  ;;  %v4235_v54 = vld [vmem:[#allocation9 + $0x438] sm:$0xff]  }
  0x9c   :  { %2010 = vmatprep.mubr.bf16.mxu1 %v2827_v24  ;;  %v4238_v55 = vld [vmem:[#allocation9 + $0x4b8] sm:$0xff]  }
  0x9d   :  { %3189 = vmatpush3.bf16.msra.mxu0 %v3702_v56  ;;  %v458_v56 = vld [vmem:[#allocation4 + $0x40] sm:$0xff]  ;;  %v4280_v21 = vld [vmem:[#allocation9 + $0x5d8] sm:$0xff]  }
  0x9e   :  { %3211 = vmatpush3.bf16.msra.mxu1 %v3703_v57  ;;  %3190 = vmatprep.subr.bf16.mxu0 %v3704_v58  ;;  %v2828_v57 = vcombine.low %v458_v56, %v458_v56  ;;  %v2829_v58 = vcombine.high %v458_v56, %v458_v56  ;;  %4542 = vst [vmem:[#allocation26_spill] sm:$0xff] %v4280_v21  ;;  %v4286_v24 = vld [vmem:[#allocation9 + $0x598] sm:$0xff]   ;;  %v4289_v56 = vld [vmem:[#allocation9 + $0x560] sm:$0xff]  }
  0x9f   :  { %3212 = vmatprep.subr.bf16.mxu1 %v3705_v59  ;;  %v459_v59 = vld [vmem:[#allocation4 + $0x48] sm:$0xff]  ;;  %4544 = vst [vmem:[#allocation28_spill] sm:$0xff] %v4286_v24  ;;  %4545 = vst [vmem:[#allocation29_spill] sm:$0xff] %v4289_v56 }
  0xa1   :  { %3191 = vmatpush3.bf16.msra.mxu0 %v3706_v60  ;;  %v2830_v60 = vcombine.low %v459_v59, %v459_v59 }
  0xa2   :  { %3213 = vmatpush3.bf16.msra.mxu1 %v3707_v61  ;;  %3192 = vmatprep.subr.bf16.mxu0 %v3708_v62  ;;  %v2831_v61 = vcombine.high %v459_v59, %v459_v59  ;;  %v4242_v62 = vld [vmem:[#allocation9 + $0x540] sm:$0xff]  }
  0xa3   :  { %3214 = vmatprep.subr.bf16.mxu1 %v3709_v63  ;;  %v4244_v63 = vld [vmem:[#allocation9 + $0x5c0] sm:$0xff]  }
  0xa4   :  { %4530 = vst [vmem:[#allocation14_spill] sm:$0xff] %v4244_v63  ;;  %v4298_v59 = vld [vmem:[#allocation9 + $0x5a0] sm:$0xff]  }
  0xa5   :  { %3193 = vmatpush3.bf16.msra.mxu0 %v3710_v0  ;;  %v4247_v0 = vld [vmem:[#allocation9 + $0x500] sm:$0xff]   ;;  %4548 = vst [vmem:[#allocation32_spill] sm:$0xff] %v4298_v59 }
  0xa6   :  { %3215 = vmatpush3.bf16.msra.mxu1 %v3711_v1  ;;  %3194 = vmatprep.subr.bf16.mxu0 %v3712_v2  ;;  %4531 = vst [vmem:[#allocation15_spill] sm:$0xff] %v4247_v0  ;;  %v4249_v1 = vld [vmem:[#allocation9 + $0x580] sm:$0xff]   ;;  %v4253_v2 = vld [vmem:[#allocation9 + $0x548] sm:$0xff]  }
  0xa7   :  { %3216 = vmatprep.subr.bf16.mxu1 %v3713_v3  ;;  %4532 = vst [vmem:[#allocation16_spill] sm:$0xff] %v4249_v1  ;;  %4533 = vst [vmem:[#allocation17_spill] sm:$0xff] %v4253_v2  ;;  %v4256_v3 = vld [vmem:[#allocation9 + $0x5c8] sm:$0xff]  }
  0xa8   :  { %4534 = vst [vmem:[#allocation18_spill] sm:$0xff] %v4256_v3 }
  0xa9   :  { %3195 = vmatpush3.bf16.msra.mxu0 %v3714_v4  ;;  %v4259_v4 = vld [vmem:[#allocation9 + $0x508] sm:$0xff]  }
  0xaa   :  { %3217 = vmatpush3.bf16.msra.mxu1 %v3715_v5  ;;  %3196 = vmatprep.subr.bf16.mxu0 %v3716_v6  ;;  %4535 = vst [vmem:[#allocation19_spill] sm:$0xff] %v4259_v4  ;;  %v4262_v5 = vld [vmem:[#allocation9 + $0x588] sm:$0xff]   ;;  %v4265_v6 = vld [vmem:[#allocation9 + $0x550] sm:$0xff]  }
  0xab   :  { %3218 = vmatprep.subr.bf16.mxu1 %v4116_v7  ;;  %4536 = vst [vmem:[#allocation20_spill] sm:$0xff] %v4262_v5  ;;  %4537 = vst [vmem:[#allocation21_spill] sm:$0xff] %v4265_v6 }
  0xad   :  { %3197 = vmatpush3.bf16.msra.mxu0 %v3718_v8  ;;  %v4268_v8 = vld [vmem:[#allocation9 + $0x5d0] sm:$0xff]  }
  0xae   :  { %3219 = vmatpush3.bf16.msra.mxu1 %v4119_v9  ;;  %3198 = vmatprep.subr.bf16.mxu0 %v4121_v10  ;;  %4538 = vst [vmem:[#allocation22_spill] sm:$0xff] %v4268_v8 }
  0xaf   :  { %3220 = vmatprep.subr.bf16.mxu1 %v4124_v11 }
  0xb1   :  { %3199 = vmatpush3.bf16.msra.mxu0 %v4127_v12 }
  0xb2   :  { %3221 = vmatpush3.bf16.msra.mxu1 %v4130_v13  ;;  %3200 = vmatprep.subr.bf16.mxu0 %v4132_v14 }
  0xb3   :  { %3222 = vmatprep.subr.bf16.mxu1 %v4136_v15 }
  0xb5   :  { %3201 = vmatpush3.bf16.msra.mxu0 %v4139_v16 }
  0xb6   :  { %3223 = vmatpush3.bf16.msra.mxu1 %v4142_v17  ;;  %3230 = vmatprep.subr.bf16.mxu0 %v4146_v23 }
  0xb7   :  { %3252 = vmatprep.subr.bf16.mxu1 %v4148_v25 }
  0xb8   :  { %1971 = vmatmul.mubr.bf16.vlgmr.msra.gmra.mrb[12].mxu0 %v2824_v20  ;;  %v4277_v20 = vld [vmem:[#allocation9 + $0x558] sm:$0xff]  }
  0xb9   :  { %2011 = vmatmul.mubr.bf16.vlgmr.msra.gmra.mrb[12].mxu1 %v2826_v22  ;;  %3231 = vmatpush3.bf16.msra.mxu0 %v4151_v26  ;;  %4541 = vst [vmem:[#allocation25_spill] sm:$0xff] %v4277_v20  ;;  %v4283_v22 = vld [vmem:[#allocation9 + $0x518] sm:$0xff]  }
  0xba   :  { %3253 = vmatpush3.bf16.msra.mxu1 %v4153_v27  ;;  %3232 = vmatprep.subr.bf16.mxu0 %v4156_v28  ;;  %4543 = vst [vmem:[#allocation27_spill] sm:$0xff] %v4283_v22 }
  0xbb   :  { %3254 = vmatprep.subr.bf16.mxu1 %v4160_v29  ;;  %2050 = vmatprep.mubr.bf16.mxu0 %v2829_v58  ;;  %v4295_v58 = vld [vmem:[#allocation9 + $0x520] sm:$0xff]  }
  0xbc   :  { %2090 = vmatprep.mubr.bf16.mxu1 %v2831_v61  ;;  %4547 = vst [vmem:[#allocation31_spill] sm:$0xff] %v4295_v58  ;;  %v4304_v61 = vld [vmem:[#allocation9 + $0x5e8] sm:$0xff]  }
  0xbd   :  { %3233 = vmatpush3.bf16.msra.mxu0 %v4163_v30  ;;  %4550 = vst [vmem:[#allocation34_spill] sm:$0xff] %v4304_v61 }
  0xbe   :  { %3255 = vmatpush3.bf16.msra.mxu1 %v4166_v31  ;;  %3234 = vmatprep.subr.bf16.mxu0 %v4168_v32 }
  0xbf   :  { %3256 = vmatprep.subr.bf16.mxu1 %v4172_v33 }
  0xc1   :  { %3235 = vmatpush3.bf16.msra.mxu0 %v4175_v34 }
  0xc2   :  { %3257 = vmatpush3.bf16.msra.mxu1 %v4178_v35  ;;  %3236 = vmatprep.subr.bf16.mxu0 %v4180_v36 }
  0xc3   :  { %3258 = vmatprep.subr.bf16.mxu1 %v4184_v37 }
  0xc5   :  { %3237 = vmatpush3.bf16.msra.mxu0 %v4187_v38 }
  0xc6   :  { %3259 = vmatpush3.bf16.msra.mxu1 %v4190_v39  ;;  %3238 = vmatprep.subr.bf16.mxu0 %v4192_v40 }
  0xc7   :  { %3260 = vmatprep.subr.bf16.mxu1 %v4196_v41 }
  0xc9   :  { %3239 = vmatpush3.bf16.msra.mxu0 %v4199_v42 }
  0xca   :  { %3261 = vmatpush3.bf16.msra.mxu1 %v4202_v43  ;;  %3240 = vmatprep.subr.bf16.mxu0 %v4204_v44 }
  0xcb   :  { %3262 = vmatprep.subr.bf16.mxu1 %v4208_v45 }
  0xcd   :  { %3241 = vmatpush3.bf16.msra.mxu0 %v4211_v46 }
  0xce   :  { %3263 = vmatpush3.bf16.msra.mxu1 %v4214_v47  ;;  %3242 = vmatprep.subr.bf16.mxu0 %v4216_v48 }
  0xcf   :  { %3264 = vmatprep.subr.bf16.mxu1 %v4220_v49 }
  0xd1   :  { %3243 = vmatpush3.bf16.msra.mxu0 %v4223_v50 }
  0xd2   :  { %3265 = vmatpush3.bf16.msra.mxu1 %v4226_v51  ;;  %3244 = vmatprep.subr.bf16.mxu0 %v4228_v52 }
  0xd3   :  { %3266 = vmatprep.subr.bf16.mxu1 %v4232_v53 }
  0xd5   :  { %3245 = vmatpush3.bf16.msra.mxu0 %v4235_v54 }
  0xd6   :  { %3267 = vmatpush3.bf16.msra.mxu1 %v4238_v55  ;;  %3274 = vmatprep.subr.bf16.mxu0 %v4242_v62 }
  0xd7   :  { %3296 = vmatprep.subr.bf16.mxu1 %v4244_v63  ;;  %v3921_v63 = vld [vmem:[#allocation9 + $0x2f0] sm:$0xff]  }
  0xd8   :  { %2051 = vmatmul.mubr.bf16.vlgmr.msra.gmra.mrb[16].mxu0 %v2828_v57  ;;  %v4292_v57 = vld [vmem:[#allocation9 + $0x5e0] sm:$0xff]  }
  0xd9   :  { %2091 = vmatmul.mubr.bf16.vlgmr.msra.gmra.mrb[16].mxu1 %v2830_v60  ;;  %3275 = vmatpush3.bf16.msra.mxu0 %v4247_v0  ;;  %4546 = vst [vmem:[#allocation30_spill] sm:$0xff] %v4292_v57  ;;  %v4301_v60 = vld [vmem:[#allocation9 + $0x568] sm:$0xff]   ;;  %v3889_v0 = vld [vmem:[#allocation9 + $0x1f0] sm:$0xff]  }
  0xda   :  { %3297 = vmatpush3.bf16.msra.mxu1 %v4249_v1  ;;  %3276 = vmatprep.subr.bf16.mxu0 %v4253_v2  ;;  %4549 = vst [vmem:[#allocation33_spill] sm:$0xff] %v4301_v60  ;;  %v3887_v1 = vld [vmem:[#allocation9 + $0x1a8] sm:$0xff]  }
  0xdb   :  { %3298 = vmatprep.subr.bf16.mxu1 %v4256_v3  ;;  %v3885_v3 = vld [vmem:[#allocation9 + $0x1e8] sm:$0xff]  }
  0xdd   :  { %3277 = vmatpush3.bf16.msra.mxu0 %v4259_v4  ;;  %v3884_v4 = vld [vmem:[#allocation9 + $0x168] sm:$0xff]  }
  0xde   :  { %3299 = vmatpush3.bf16.msra.mxu1 %v4262_v5  ;;  %3278 = vmatprep.subr.bf16.mxu0 %v4265_v6  ;;  %v3836_v6 = vld [vmem:[#allocation9 + $0x48] sm:$0xff]   ;;  %v3883_v5 = vld [vmem:[#allocation9 + $0x1a0] sm:$0xff]  }
  0xdf   :  { %3300 = vmatprep.subr.bf16.mxu1 %v4268_v8  ;;  %v3833_v8 = vld [vmem:[#allocation9 + $0xc0] sm:$0xff]  }
  0xe1   :  { %3279 = vmatpush3.bf16.msra.mxu0 %v4271_v18  ;;  %v4337_v18 = vld [vmem:[#allocation7] sm:$0xff] }
  0xe2   :  { %3301 = vmatpush3.bf16.msra.mxu1 %v4274_v19  ;;  %3280 = vmatprep.subr.bf16.mxu0 %v4277_v20 }
  0xe3   :  { %3302 = vmatprep.subr.bf16.mxu1 %v4280_v21 }
  0xe5   :  { %3281 = vmatpush3.bf16.msra.mxu0 %v4283_v22  ;;  %v460_v22 = vld [vmem:[#allocation4 + $0x50] sm:$0xff] }
  0xe6   :  { %3303 = vmatpush3.bf16.msra.mxu1 %v4286_v24  ;;  %3282 = vmatprep.subr.bf16.mxu0 %v4289_v56  ;;  %v4307_v24 = vld [vmem:[#allocation9 + $0x528] sm:$0xff]   ;;  %v2832_v21 = vcombine.low %v460_v22, %v460_v22 }
  0xe7   :  { %3304 = vmatprep.subr.bf16.mxu1 %v4292_v57  ;;  %4551 = vst [vmem:[#allocation35_spill] sm:$0xff] %v4307_v24  ;;  %v4310_v56 = vld [vmem:[#allocation9 + $0x5a8] sm:$0xff]   ;;  %v4313_v57 = vld [vmem:[#allocation9 + $0x570] sm:$0xff]  }
  0xe8   :  { %4552 = vst [vmem:[#allocation36_spill] sm:$0xff] %v4310_v56  ;;  %4553 = vst [vmem:[#allocation37_spill] sm:$0xff] %v4313_v57 }
  0xe9   :  { %3283 = vmatpush3.bf16.msra.mxu0 %v4295_v58  ;;  %v4316_v58 = vld [vmem:[#allocation9 + $0x5f0] sm:$0xff]  }
  0xea   :  { %3305 = vmatpush3.bf16.msra.mxu1 %v4298_v59  ;;  %3284 = vmatprep.subr.bf16.mxu0 %v4301_v60  ;;  %4554 = vst [vmem:[#allocation38_spill] sm:$0xff] %v4316_v58  ;;  %v4319_v59 = vld [vmem:[#allocation9 + $0x530] sm:$0xff]  }
  0xeb   :  { %3306 = vmatprep.subr.bf16.mxu1 %v4304_v61  ;;  %4555 = vst [vmem:[#allocation39_spill] sm:$0xff] %v4319_v59  ;;  %v4322_v60 = vld [vmem:[#allocation9 + $0x5b0] sm:$0xff]   ;;  %v4325_v61 = vld [vmem:[#allocation9 + $0x578] sm:$0xff]  }
  0xec   :  { %4556 = vst [vmem:[#allocation40_spill] sm:$0xff] %v4322_v60  ;;  %4557 = vst [vmem:[#allocation41_spill] sm:$0xff] %v4325_v61 }
  0xed   :  { %3285 = vmatpush3.bf16.msra.mxu0 %v4307_v24  ;;  %v4328_v24 = vld [vmem:[#allocation9 + $0x5f8] sm:$0xff]  }
  0xee   :  { %3307 = vmatpush3.bf16.msra.mxu1 %v4310_v56  ;;  %3286 = vmatprep.subr.bf16.mxu0 %v4313_v57  ;;  %4558 = vst [vmem:[#allocation42_spill] sm:$0xff] %v4328_v24  ;;  %v4331_v56 = vld [vmem:[#allocation9 + $0x538] sm:$0xff]  }
  0xef   :  { %3308 = vmatprep.subr.bf16.mxu1 %v4316_v58  ;;  %4559 = vst [vmem:[#allocation43_spill] sm:$0xff] %v4331_v56  ;;  %v4334_v57 = vld [vmem:[#allocation9 + $0x5b8] sm:$0xff]  }
  0xf0   :  { %4560 = vst [vmem:[#allocation44_spill] sm:$0xff] %v4334_v57  ;;  %v461_v58 = vld [vmem:[#allocation4 + $0x58] sm:$0xff] }
  0xf1   :  { %3287 = vmatpush3.bf16.msra.mxu0 %v4319_v59  ;;  %v2833_v59 = vcombine.high %v460_v22, %v460_v22  ;;  %v2834_v20 = vcombine.low %v461_v58, %v461_v58  ;;  %v2835_v19 = vcombine.high %v461_v58, %v461_v58  ;;  %v3834_v58 = vld [vmem:[#allocation9] sm:$0xff]  }
  0xf2   :  { %3309 = vmatpush3.bf16.msra.mxu1 %v4322_v60  ;;  %3288 = vmatprep.subr.bf16.mxu0 %v4325_v61  ;;  %v4339_v60 = vld [vmem:[#allocation7 + $0x8] sm:$0xff]  ;;  %v3832_v61 = vld [vmem:[#allocation9 + $0x40] sm:$0xff]  }
  0xf3   :  { %3310 = vmatprep.subr.bf16.mxu1 %v4328_v24  ;;  %2130 = vmatprep.mubr.bf16.mxu0 %v2833_v59  ;;  %v3029_v24 = vcombine.high %v4337_v18, %v4337_v18  ;;  %v3031_v22 = vcombine.high %v4339_v60, %v4339_v60  ;;  %v3839_v59 = vld [vmem:[#allocation9 + $0x88] sm:$0xff]  }
  0xf4   :  { %2170 = vmatprep.mubr.bf16.mxu1 %v2835_v19  ;;  %v3838_v19 = vld [vmem:[#allocation9 + $0x8] sm:$0xff]  }
  0xf5   :  { %3289 = vmatpush3.bf16.msra.mxu0 %v4331_v56  ;;  %v3835_v56 = vld [vmem:[#allocation9 + $0x80] sm:$0xff]  }
  0xf6   :  { %3311 = vmatpush3.bf16.msra.mxu1 %v4334_v57  ;;  %3318 = vmatprep.subr.bf16.mxu0 %v3832_v61  ;;  %v3837_v57 = vld [vmem:[#allocation9 + $0xc8] sm:$0xff]   ;;  %v3842_v61 = vld [vmem:[#allocation9 + $0x10] sm:$0xff]  }
  0xf7   :  { %3340 = vmatprep.subr.bf16.mxu1 %v3833_v8  ;;  %v3841_v8 = vld [vmem:[#allocation9 + $0xd0] sm:$0xff]  }
  0xf8   :  { %2131 = vmatmul.mubr.bf16.vlgmr.msra.gmra.mrb[20].mxu0 %v2832_v21  ;;  %v3840_v21 = vld [vmem:[#allocation9 + $0x50] sm:$0xff]  }
  0xf9   :  { %2171 = vmatmul.mubr.bf16.vlgmr.msra.gmra.mrb[20].mxu1 %v2834_v20  ;;  %3319 = vmatpush3.bf16.msra.mxu0 %v3834_v58  ;;  %v3843_v20 = vld [vmem:[#allocation9 + $0x90] sm:$0xff]   ;;  %v3844_v58 = vld [vmem:[#allocation9 + $0x58] sm:$0xff]  }
  0xfa   :  { %3341 = vmatpush3.bf16.msra.mxu1 %v3835_v56  ;;  %3320 = vmatprep.subr.bf16.mxu0 %v3836_v6  ;;  %v3845_v56 = vld [vmem:[#allocation9 + $0xd8] sm:$0xff]  }
  0xfb   :  { %3342 = vmatprep.subr.bf16.mxu1 %v3837_v57  ;;  %2309 = vmatprep.mubr.bf16.mxu0 %v3029_v24  ;;  %v3846_v6 = vld [vmem:[#allocation9 + $0x18] sm:$0xff]   ;;  %v3848_v57 = vld [vmem:[#allocation9 + $0x60] sm:$0xff]  }
  0xfc   :  { %2349 = vmatprep.mubr.bf16.mxu1 %v3031_v22  ;;  %v3847_v24 = vld [vmem:[#allocation9 + $0x98] sm:$0xff]   ;;  %v3849_v22 = vld [vmem:[#allocation9 + $0xe0] sm:$0xff]  }
  0xfd   :  { %3321 = vmatpush3.bf16.msra.mxu0 %v3838_v19  ;;  %v3850_v19 = vld [vmem:[#allocation9 + $0x20] sm:$0xff]  }
  0xfe   :  { %3343 = vmatpush3.bf16.msra.mxu1 %v3839_v59  ;;  %3322 = vmatprep.subr.bf16.mxu0 %v3840_v21  ;;  %v3851_v59 = vld [vmem:[#allocation9 + $0xa0] sm:$0xff]   ;;  %v3852_v21 = vld [vmem:[#allocation9 + $0x68] sm:$0xff]  }
  0xff   :  { %3344 = vmatprep.subr.bf16.mxu1 %v3841_v8  ;;  %v3853_v8 = vld [vmem:[#allocation9 + $0xe8] sm:$0xff]  }
 0x101   :  { %3323 = vmatpush3.bf16.msra.mxu0 %v3842_v61  ;;  %v3854_v61 = vld [vmem:[#allocation9 + $0x28] sm:$0xff]  }
 0x102   :  { %3345 = vmatpush3.bf16.msra.mxu1 %v3843_v20  ;;  %3324 = vmatprep.subr.bf16.mxu0 %v3844_v58  ;;  %v3855_v20 = vld [vmem:[#allocation9 + $0xa8] sm:$0xff]   ;;  %v3856_v58 = vld [vmem:[#allocation9 + $0x70] sm:$0xff]  }
 0x103   :  { %3346 = vmatprep.subr.bf16.mxu1 %v3845_v56  ;;  %v3857_v56 = vld [vmem:[#allocation9 + $0xf0] sm:$0xff]  }
 0x105   :  { %3325 = vmatpush3.bf16.msra.mxu0 %v3846_v6  ;;  %v3858_v6 = vld [vmem:[#allocation9 + $0x30] sm:$0xff]  }
 0x106   :  { %3347 = vmatpush3.bf16.msra.mxu1 %v3847_v24  ;;  %3326 = vmatprep.subr.bf16.mxu0 %v3848_v57  ;;  %v3859_v24 = vld [vmem:[#allocation9 + $0xb0] sm:$0xff]   ;;  %v3860_v57 = vld [vmem:[#allocation9 + $0x78] sm:$0xff]  }
 0x107   :  { %3348 = vmatprep.subr.bf16.mxu1 %v3849_v22  ;;  %v3861_v22 = vld [vmem:[#allocation9 + $0xf8] sm:$0xff]  }
 0x109   :  { %3327 = vmatpush3.bf16.msra.mxu0 %v3850_v19  ;;  %v3028_v19 = vcombine.low %v4337_v18, %v4337_v18 }
 0x10a   :  { %3349 = vmatpush3.bf16.msra.mxu1 %v3851_v59  ;;  %3328 = vmatprep.subr.bf16.mxu0 %v3852_v21  ;;  %v4348_v59 = vld [vmem:[#allocation7 + $0x10] sm:$0xff]  ;;  %v3862_v21 = vld [vmem:[#allocation9 + $0x38] sm:$0xff]  }
 0x10b   :  { %3350 = vmatprep.subr.bf16.mxu1 %v3853_v8  ;;  %v3030_v8 = vcombine.low %v4339_v60, %v4339_v60  ;;  %v3868_v60 = vld [vmem:[#allocation9 + $0x148] sm:$0xff]  }
 0x10d   :  { %3329 = vmatpush3.bf16.msra.mxu0 %v3854_v61  ;;  %v4352_v61 = vld [vmem:[#allocation7 + $0x18] sm:$0xff] }
 0x10e   :  { %3351 = vmatpush3.bf16.msra.mxu1 %v3855_v20  ;;  %3330 = vmatprep.subr.bf16.mxu0 %v3856_v58  ;;  %v3863_v20 = vld [vmem:[#allocation9 + $0xb8] sm:$0xff]   ;;  %v3864_v58 = vld [vmem:[#allocation9 + $0x140] sm:$0xff]   ;;  %v3035_v18 = vcombine.high %v4352_v61, %v4352_v61 }
 0x10f   :  { %3352 = vmatprep.subr.bf16.mxu1 %v3857_v56  ;;  %v3865_v56 = vld [vmem:[#allocation9 + $0x1c0] sm:$0xff]  }
 0x111   :  { %3331 = vmatpush3.bf16.msra.mxu0 %v3858_v6  ;;  %v3033_v6 = vcombine.high %v4348_v59, %v4348_v59 }
 0x112   :  { %3353 = vmatpush3.bf16.msra.mxu1 %v3859_v24  ;;  %3332 = vmatprep.subr.bf16.mxu0 %v3860_v57  ;;  %v3866_v24 = vld [vmem:[#allocation9 + $0x100] sm:$0xff]  }
 0x113   :  { %3354 = vmatprep.subr.bf16.mxu1 %v3861_v22  ;;  %v3867_v57 = vld [vmem:[#allocation9 + $0x180] sm:$0xff]   ;;  %v3869_v22 = vld [vmem:[#allocation9 + $0x1c8] sm:$0xff]  }
 0x115   :  { %3333 = vmatpush3.bf16.msra.mxu0 %v3862_v21  ;;  %v3870_v21 = vld [vmem:[#allocation9 + $0x108] sm:$0xff]  }
 0x116   :  { %3355 = vmatpush3.bf16.msra.mxu1 %v3863_v20  ;;  %3362 = vmatprep.subr.bf16.mxu0 %v3864_v58  ;;  %v3871_v20 = vld [vmem:[#allocation9 + $0x188] sm:$0xff]   ;;  %v3872_v58 = vld [vmem:[#allocation9 + $0x150] sm:$0xff]  }
 0x117   :  { %3384 = vmatprep.subr.bf16.mxu1 %v3865_v56  ;;  %v3874_v56 = vld [vmem:[#allocation9 + $0x110] sm:$0xff]  }
 0x118   :  { %2310 = vmatmul.mubr.bf16.vlgmr.msra.gmra.mrb[24].mxu0 %v3028_v19  ;;  %v3873_v19 = vld [vmem:[#allocation9 + $0x1d0] sm:$0xff]  }
 0x119   :  { %2350 = vmatmul.mubr.bf16.vlgmr.msra.gmra.mrb[24].mxu1 %v3030_v8  ;;  %3363 = vmatpush3.bf16.msra.mxu0 %v3866_v24  ;;  %v3875_v8 = vld [vmem:[#allocation9 + $0x190] sm:$0xff]   ;;  %v3876_v24 = vld [vmem:[#allocation9 + $0x158] sm:$0xff]  }
 0x11a   :  { %3385 = vmatpush3.bf16.msra.mxu1 %v3867_v57  ;;  %3364 = vmatprep.subr.bf16.mxu0 %v3868_v60  ;;  %v3877_v57 = vld [vmem:[#allocation9 + $0x1d8] sm:$0xff]  }
 0x11b   :  { %3386 = vmatprep.subr.bf16.mxu1 %v3869_v22  ;;  %2389 = vmatprep.mubr.bf16.mxu0 %v3033_v6  ;;  %v3878_v60 = vld [vmem:[#allocation9 + $0x118] sm:$0xff]   ;;  %v3881_v22 = vld [vmem:[#allocation9 + $0x1e0] sm:$0xff]  }
 0x11c   :  { %2429 = vmatprep.mubr.bf16.mxu1 %v3035_v18  ;;  %v3879_v6 = vld [vmem:[#allocation9 + $0x198] sm:$0xff]   ;;  %v3880_v18 = vld [vmem:[#allocation9 + $0x160] sm:$0xff]  }
 0x11d   :  { %3365 = vmatpush3.bf16.msra.mxu0 %v3870_v21 }
 0x11e   :  { %3387 = vmatpush3.bf16.msra.mxu1 %v3871_v20  ;;  %3366 = vmatprep.subr.bf16.mxu0 %v3872_v58  ;;  %v3882_v58 = vld [vmem:[#allocation9 + $0x120] sm:$0xff]  }
 0x11f   :  { %3388 = vmatprep.subr.bf16.mxu1 %v3873_v19 }
 0x121   :  { %3367 = vmatpush3.bf16.msra.mxu0 %v3874_v56 }
 0x122   :  { %3389 = vmatpush3.bf16.msra.mxu1 %v3875_v8  ;;  %3368 = vmatprep.subr.bf16.mxu0 %v3876_v24 }
 0x123   :  { %3390 = vmatprep.subr.bf16.mxu1 %v3877_v57 }
 0x125   :  { %3369 = vmatpush3.bf16.msra.mxu0 %v3878_v60 }
 0x126   :  { %3391 = vmatpush3.bf16.msra.mxu1 %v3879_v6  ;;  %3370 = vmatprep.subr.bf16.mxu0 %v3880_v18 }
 0x127   :  { %3392 = vmatprep.subr.bf16.mxu1 %v3881_v22  ;;  %v3886_v22 = vld [vmem:[#allocation9 + $0x128] sm:$0xff]  }
 0x129   :  { %3371 = vmatpush3.bf16.msra.mxu0 %v3882_v58  ;;  %v3888_v58 = vld [vmem:[#allocation9 + $0x170] sm:$0xff]  }
 0x12a   :  { %3393 = vmatpush3.bf16.msra.mxu1 %v3883_v5  ;;  %3372 = vmatprep.subr.bf16.mxu0 %v3884_v4  ;;  %v3890_v5 = vld [vmem:[#allocation9 + $0x130] sm:$0xff]   ;;  %v3892_v4 = vld [vmem:[#allocation9 + $0x178] sm:$0xff]  }
 0x12b   :  { %v3070_v21 = vpop.f32.mrb[0].mxu0  ;;  %3394 = vmatprep.subr.bf16.mxu1 %v3885_v3  ;;  %v3032_v3 = vcombine.low %v4348_v59, %v4348_v59 }
 0x12c   :  { %v3092_v20 = vpop.f32.mrb[0].mxu1  ;;  %v3071_v19 = vpop.f32.mrb[1].mxu0 }
 0x12d   :  { %v3093_v56 = vpop.f32.mrb[1].mxu1  ;;  %v3072_v8 = vadd.f32 %v3071_v19, %v3070_v21  ;;  %v3073_v57 = vpop.f32.mrb[2].mxu0  ;;  %3373 = vmatpush3.bf16.msra.mxu0 %v3886_v22  ;;  %v3891_v21 = vld [vmem:[#allocation9 + $0x1b0] sm:$0xff]   ;;  %v4362_v19 = vld [vmem:[#allocation7 + $0x20] sm:$0xff]  ;;  %v3901_v22 = vld [vmem:[#allocation9 + $0x2c8] sm:$0xff]  }
 0x12e   :  { %v3094_v24 = vadd.f32 %v3093_v56, %v3092_v20  ;;  %v3095_v60 = vpop.f32.mrb[2].mxu1  ;;  %v3074_v6 = vpop.f32.mrb[3].mxu0  ;;  %3395 = vmatpush3.bf16.msra.mxu1 %v3887_v1  ;;  %3374 = vmatprep.subr.bf16.mxu0 %v3888_v58  ;;  %v3893_v20 = vld [vmem:[#allocation9 + $0x1f8] sm:$0xff]   ;;  %v3034_v1 = vcombine.low %v4352_v61, %v4352_v61  ;;  %v3897_v57 = vld [vmem:[#allocation9 + $0x2c0] sm:$0xff]   ;;  %v3900_v61 = vld [vmem:[#allocation9 + $0x248] sm:$0xff]  }
 0x12f   :  { %v3096_v18 = vpop.f32.mrb[3].mxu1  ;;  %3396 = vmatprep.subr.bf16.mxu1 %v3889_v0  ;;  %v3894_v56 = vld [vmem:[#allocation9 + $0x138] sm:$0xff]   ;;  %v3037_v60 = vcombine.high %v4362_v19, %v4362_v19  ;;  %v3898_v6 = vld [vmem:[#allocation9 + $0x200] sm:$0xff]   ;;  %v3902_v58 = vld [vmem:[#allocation9 + $0x208] sm:$0xff]  }
 0x130   :  { %v4358_v2 = vadd.f32 %v3094_v24, %v3072_v8  ;;  %v4366_v8 = vld [vmem:[#allocation7 + $0x28] sm:$0xff]  ;;  %v3895_v0 = vld [vmem:[#allocation9 + $0x1b8] sm:$0xff]   ;;  %v3896_v24 = vld [vmem:[#allocation9 + $0x240] sm:$0xff]  }
 0x131   :  { %3375 = vmatpush3.bf16.msra.mxu0 %v3890_v5  ;;  %v3039_v59 = vcombine.high %v4366_v8, %v4366_v8  ;;  %v3899_v18 = vld [vmem:[#allocation9 + $0x280] sm:$0xff]   ;;  %v3903_v5 = vld [vmem:[#allocation9 + $0x288] sm:$0xff]  }
 0x132   :  { %3397 = vmatpush3.bf16.msra.mxu1 %v3891_v21  ;;  %3376 = vmatprep.subr.bf16.mxu0 %v3892_v4  ;;  %v3904_v21 = vld [vmem:[#allocation9 + $0x250] sm:$0xff]  }
 0x133   :  { %3398 = vmatprep.subr.bf16.mxu1 %v3893_v20  ;;  %v3905_v4 = vld [vmem:[#allocation9 + $0x2d0] sm:$0xff]  }
 0x134   :  { %v3906_v20 = vld [vmem:[#allocation9 + $0x210] sm:$0xff]  }
 0x135   :  { %3377 = vmatpush3.bf16.msra.mxu0 %v3894_v56  ;;  %v3908_v56 = vld [vmem:[#allocation9 + $0x258] sm:$0xff]  }
 0x136   :  { %3399 = vmatpush3.bf16.msra.mxu1 %v3895_v0  ;;  %3406 = vmatprep.subr.bf16.mxu0 %v3896_v24  ;;  %v3910_v0 = vld [vmem:[#allocation9 + $0x218] sm:$0xff]  }
 0x137   :  { %3428 = vmatprep.subr.bf16.mxu1 %v3897_v57  ;;  %v3911_v24 = vld [vmem:[#allocation9 + $0x298] sm:$0xff]   ;;  %v3912_v57 = vld [vmem:[#allocation9 + $0x260] sm:$0xff]  }
 0x138   :  { %2390 = vmatmul.mubr.bf16.vlgmr.msra.gmra.mrb[28].mxu0 %v3032_v3  ;;  %v3907_v3 = vld [vmem:[#allocation9 + $0x290] sm:$0xff]  }
 0x139   :  { %2430 = vmatmul.mubr.bf16.vlgmr.msra.gmra.mrb[28].mxu1 %v3034_v1  ;;  %3407 = vmatpush3.bf16.msra.mxu0 %v3898_v6  ;;  %v3909_v1 = vld [vmem:[#allocation9 + $0x2d8] sm:$0xff]  }
 0x13a   :  { %3429 = vmatpush3.bf16.msra.mxu1 %v3899_v18  ;;  %3408 = vmatprep.subr.bf16.mxu0 %v3900_v61  ;;  %v3915_v61 = vld [vmem:[#allocation9 + $0x2a0] sm:$0xff]  }
 0x13b   :  { %3430 = vmatprep.subr.bf16.mxu1 %v3901_v22  ;;  %2469 = vmatprep.mubr.bf16.mxu0 %v3037_v60  ;;  %v3913_v60 = vld [vmem:[#allocation9 + $0x2e0] sm:$0xff]  }
 0x13c   :  { %2509 = vmatprep.mubr.bf16.mxu1 %v3039_v59  ;;  %v3914_v59 = vld [vmem:[#allocation9 + $0x220] sm:$0xff]  }
 0x13d   :  { %3409 = vmatpush3.bf16.msra.mxu0 %v3902_v58 }
 0x13e   :  { %3431 = vmatpush3.bf16.msra.mxu1 %v3903_v5  ;;  %3410 = vmatprep.subr.bf16.mxu0 %v3904_v21  ;;  %v3916_v5 = vld [vmem:[#allocation9 + $0x268] sm:$0xff]  }
 0x13f   :  { %3432 = vmatprep.subr.bf16.mxu1 %v3905_v4 }
 0x141   :  { %3411 = vmatpush3.bf16.msra.mxu0 %v3906_v20  ;;  %v3917_v20 = vld [vmem:[#allocation9 + $0x2e8] sm:$0xff]  }
 0x142   :  { %3433 = vmatpush3.bf16.msra.mxu1 %v3907_v3  ;;  %3412 = vmatprep.subr.bf16.mxu0 %v3908_v56 }
 0x143   :  { %3434 = vmatprep.subr.bf16.mxu1 %v3909_v1 }
 0x145   :  { %3413 = vmatpush3.bf16.msra.mxu0 %v3910_v0 }
 0x146   :  { %3435 = vmatpush3.bf16.msra.mxu1 %v3911_v24  ;;  %3414 = vmatprep.subr.bf16.mxu0 %v3912_v57  ;;  %v3918_v57 = vld [vmem:[#allocation9 + $0x228] sm:$0xff]  }
 0x147   :  { %3436 = vmatprep.subr.bf16.mxu1 %v3913_v60  ;;  %v3919_v60 = vld [vmem:[#allocation9 + $0x2a8] sm:$0xff]  }
 0x149   :  { %3415 = vmatpush3.bf16.msra.mxu0 %v3914_v59  ;;  %v3920_v59 = vld [vmem:[#allocation9 + $0x270] sm:$0xff]  }
 0x14a   :  { %3437 = vmatpush3.bf16.msra.mxu1 %v3915_v61  ;;  %3416 = vmatprep.subr.bf16.mxu0 %v3916_v5  ;;  %v4377_v5 = vld [vmem:[#allocation7 + $0x30] sm:$0xff] }
 0x14b   :  { %v3114_v6 = vpop.f32.mrb[4].mxu0  ;;  %3438 = vmatprep.subr.bf16.mxu1 %v3917_v20  ;;  %v4381_v20 = vld [vmem:[#allocation7 + $0x38] sm:$0xff] }
 0x14c   :  { %v3136_v18 = vpop.f32.mrb[4].mxu1  ;;  %v3115_v22 = vpop.f32.mrb[5].mxu0 }
 0x14d   :  { %v3137_v58 = vpop.f32.mrb[5].mxu1  ;;  %v3116_v21 = vadd.f32 %v3115_v22, %v3114_v6  ;;  %v3117_v3 = vpop.f32.mrb[6].mxu0  ;;  %3417 = vmatpush3.bf16.msra.mxu0 %v3918_v57  ;;  %v3922_v6 = vld [vmem:[#allocation9 + $0x230] sm:$0xff]   ;;  %v3924_v22 = vld [vmem:[#allocation9 + $0x278] sm:$0xff]   ;;  %v3933_v57 = vld [vmem:[#allocation9 + $0x3c8] sm:$0xff]  }
 0x14e   :  { %v3138_v4 = vadd.f32 %v3137_v58, %v3136_v18  ;;  %v3139_v56 = vpop.f32.mrb[6].mxu1  ;;  %v3118_v1 = vpop.f32.mrb[7].mxu0  ;;  %3439 = vmatpush3.bf16.msra.mxu1 %v3919_v60  ;;  %3418 = vmatprep.subr.bf16.mxu0 %v3920_v59  ;;  %v3923_v18 = vld [vmem:[#allocation9 + $0x2b0] sm:$0xff]   ;;  %v3925_v58 = vld [vmem:[#allocation9 + $0x2f8] sm:$0xff]   ;;  %v3928_v3 = vld [vmem:[#allocation9 + $0x340] sm:$0xff]  }
 0x14f   :  { %v3140_v0 = vpop.f32.mrb[7].mxu1  ;;  %v1813_v24 = vadd.f32 %v3116_v21, %v4358_v2  ;;  %3440 = vmatprep.subr.bf16.mxu1 %v3921_v63  ;;  %v3036_v2 = vcombine.low %v4362_v19, %v4362_v19  ;;  %v3926_v21 = vld [vmem:[#allocation9 + $0x238] sm:$0xff]   ;;  %v3929_v56 = vld [vmem:[#allocation9 + $0x3c0] sm:$0xff]   ;;  %v3041_v1 = vcombine.high %v4377_v5, %v4377_v5  ;;  %v3043_v19 = vcombine.high %v4381_v20, %v4381_v20  ;;  %v3934_v60 = vld [vmem:[#allocation9 + $0x308] sm:$0xff]  }
 0x150   :  { %v3927_v63 = vld [vmem:[#allocation9 + $0x2b8] sm:$0xff]   ;;  %v3930_v0 = vld [vmem:[#allocation9 + $0x300] sm:$0xff]   ;;  %v3935_v59 = vld [vmem:[#allocation9 + $0x388] sm:$0xff]  }
 0x151   :  { %v4373_v61 = vadd.f32 %v3138_v4, %v1813_v24  ;;  %3419 = vmatpush3.bf16.msra.mxu0 %v3922_v6  ;;  %v3038_v4 = vcombine.low %v4366_v8, %v4366_v8  ;;  %v3931_v24 = vld [vmem:[#allocation9 + $0x380] sm:$0xff]   ;;  %v3932_v8 = vld [vmem:[#allocation9 + $0x348] sm:$0xff]   ;;  %v3936_v6 = vld [vmem:[#allocation9 + $0x350] sm:$0xff]  }
 0x152   :  { %3441 = vmatpush3.bf16.msra.mxu1 %v3923_v18  ;;  %3420 = vmatprep.subr.bf16.mxu0 %v3924_v22  ;;  %v3937_v18 = vld [vmem:[#allocation9 + $0x3d0] sm:$0xff]  }
 0x153   :  { %3442 = vmatprep.subr.bf16.mxu1 %v3925_v58  ;;  %v3938_v22 = vld [vmem:[#allocation9 + $0x310] sm:$0xff]  }
 0x154   :  { %v3939_v58 = vld [vmem:[#allocation9 + $0x390] sm:$0xff]  }
 0x155   :  { %3421 = vmatpush3.bf16.msra.mxu0 %v3926_v21  ;;  %v3941_v21 = vld [vmem:[#allocation9 + $0x3d8] sm:$0xff]  }
 0x156   :  { %3443 = vmatpush3.bf16.msra.mxu1 %v3927_v63  ;;  %3450 = vmatprep.subr.bf16.mxu0 %v3928_v3  ;;  %v3943_v63 = vld [vmem:[#allocation9 + $0x398] sm:$0xff]   ;;  %v3944_v3 = vld [vmem:[#allocation9 + $0x360] sm:$0xff]  }
 0x157   :  { %3472 = vmatprep.subr.bf16.mxu1 %v3929_v56  ;;  %v3945_v56 = vld [vmem:[#allocation9 + $0x3e0] sm:$0xff]  }
 0x158   :  { %2470 = vmatmul.mubr.bf16.vlgmr.msra.gmra.mrb[32].mxu0 %v3036_v2  ;;  %v3940_v2 = vld [vmem:[#allocation9 + $0x358] sm:$0xff]  }
 0x159   :  { %2510 = vmatmul.mubr.bf16.vlgmr.msra.gmra.mrb[32].mxu1 %v3038_v4  ;;  %3451 = vmatpush3.bf16.msra.mxu0 %v3930_v0  ;;  %v3942_v4 = vld [vmem:[#allocation9 + $0x318] sm:$0xff]   ;;  %v3947_v0 = vld [vmem:[#allocation9 + $0x3a0] sm:$0xff]  }
 0x15a   :  { %3473 = vmatpush3.bf16.msra.mxu1 %v3931_v24  ;;  %3452 = vmatprep.subr.bf16.mxu0 %v3932_v8 }
 0x15b   :  { %3474 = vmatprep.subr.bf16.mxu1 %v3933_v57  ;;  %2549 = vmatprep.mubr.bf16.mxu0 %v3041_v1  ;;  %v3946_v1 = vld [vmem:[#allocation9 + $0x320] sm:$0xff]   ;;  %v3948_v57 = vld [vmem:[#allocation9 + $0x368] sm:$0xff]  }
 0x15c   :  { %2589 = vmatprep.mubr.bf16.mxu1 %v3043_v19 }
 0x15d   :  { %3453 = vmatpush3.bf16.msra.mxu0 %v3934_v60 }
 0x15e   :  { %3475 = vmatpush3.bf16.msra.mxu1 %v3935_v59  ;;  %3454 = vmatprep.subr.bf16.mxu0 %v3936_v6 }
 0x15f   :  { %3476 = vmatprep.subr.bf16.mxu1 %v3937_v18 }
 0x161   :  { %3455 = vmatpush3.bf16.msra.mxu0 %v3938_v22 }
 0x162   :  { %3477 = vmatpush3.bf16.msra.mxu1 %v3939_v58  ;;  %3456 = vmatprep.subr.bf16.mxu0 %v3940_v2 }
 0x163   :  { %3478 = vmatprep.subr.bf16.mxu1 %v3941_v21  ;;  %v3949_v21 = vld [vmem:[#allocation9 + $0x328] sm:$0xff]  }
 0x165   :  { %3457 = vmatpush3.bf16.msra.mxu0 %v3942_v4 }
 0x166   :  { %3479 = vmatpush3.bf16.msra.mxu1 %v3943_v63  ;;  %3458 = vmatprep.subr.bf16.mxu0 %v3944_v3  ;;  %v4581_v3 = vld [vmem:[#allocation34_spill] sm:$0xff] }
 0x167   :  { %3480 = vmatprep.subr.bf16.mxu1 %v3945_v56 }
 0x169   :  { %3459 = vmatpush3.bf16.msra.mxu0 %v3946_v1 }
 0x16a   :  { %3481 = vmatpush3.bf16.msra.mxu1 %v3947_v0  ;;  %3460 = vmatprep.subr.bf16.mxu0 %v3948_v57  ;;  %v4582_v57 = vld [vmem:[#allocation35_spill] sm:$0xff] }
 0x16b   :  { %v3158_v19 = vpop.f32.mrb[8].mxu0  ;;  %3482 = vmatprep.subr.bf16.mxu1 %v4116_v7  ;;  %v3040_v7 = vcombine.low %v4377_v5, %v4377_v5 }
 0x16c   :  { %v3180_v24 = vpop.f32.mrb[8].mxu1  ;;  %v3159_v8 = vpop.f32.mrb[9].mxu0 }
 0x16d   :  { %v3160_v60 = vadd.f32 %v3159_v8, %v3158_v19  ;;  %v3181_v59 = vpop.f32.mrb[9].mxu1  ;;  %v3161_v6 = vpop.f32.mrb[10].mxu0  ;;  %3461 = vmatpush3.bf16.msra.mxu0 %v3949_v21  ;;  %v4586_v21 = vld [vmem:[#allocation39_spill] sm:$0xff] }
 0x16e   :  { %v3182_v18 = vadd.f32 %v3181_v59, %v3180_v24  ;;  %v3183_v22 = vpop.f32.mrb[10].mxu1  ;;  %v3162_v58 = vpop.f32.mrb[11].mxu0  ;;  %3483 = vmatpush3.bf16.msra.mxu1 %v4119_v9  ;;  %3462 = vmatprep.subr.bf16.mxu0 %v4121_v10  ;;  %v3042_v9 = vcombine.low %v4381_v20, %v4381_v20  ;;  %v2190_v10 = vld [vmem:[#allocation7 + $0x48] sm:$0xff] }
 0x16f   :  { %v1893_v2 = vadd.f32 %v3160_v60, %v4373_v61  ;;  %v3184_v4 = vpop.f32.mrb[11].mxu1  ;;  %3484 = vmatprep.subr.bf16.mxu1 %v4124_v11  ;;  %v2189_v61 = vld [vmem:[#allocation7 + $0x40] sm:$0xff]  ;;  %v4583_v60 = vld [vmem:[#allocation36_spill] sm:$0xff]  ;;  %v4585_v58 = vld [vmem:[#allocation38_spill] sm:$0xff] }
 0x170   :  { %v3045_v11 = vcombine.high %v2189_v61, %v2189_v61  ;;  %v4587_v4 = vld [vmem:[#allocation40_spill] sm:$0xff] }
 0x171   :  { %v1933_v63 = vadd.f32 %v3182_v18, %v1893_v2  ;;  %3463 = vmatpush3.bf16.msra.mxu0 %v4127_v12  ;;  %v3047_v12 = vcombine.high %v2190_v10, %v2190_v10  ;;  %v4584_v18 = vld [vmem:[#allocation37_spill] sm:$0xff] }
 0x172   :  { %3485 = vmatpush3.bf16.msra.mxu1 %v4130_v13  ;;  %3464 = vmatprep.subr.bf16.mxu0 %v4132_v14 }
 0x173   :  { %3486 = vmatprep.subr.bf16.mxu1 %v4136_v15 }
 0x175   :  { %3465 = vmatpush3.bf16.msra.mxu0 %v4139_v16 }
 0x176   :  { %3487 = vmatpush3.bf16.msra.mxu1 %v4142_v17  ;;  %3494 = vmatprep.subr.bf16.mxu0 %v4146_v23 }
 0x177   :  { %3516 = vmatprep.subr.bf16.mxu1 %v4148_v25 }
 0x178   :  { %2550 = vmatmul.mubr.bf16.vlgmr.msra.gmra.mrb[36].mxu0 %v3040_v7  ;;  %v4589_v7 = vld [vmem:[#allocation42_spill] sm:$0xff] }
 0x179   :  { %2590 = vmatmul.mubr.bf16.vlgmr.msra.gmra.mrb[36].mxu1 %v3042_v9  ;;  %3495 = vmatpush3.bf16.msra.mxu0 %v4151_v26  ;;  %v4590_v9 = vld [vmem:[#allocation43_spill] sm:$0xff] }
 0x17a   :  { %3517 = vmatpush3.bf16.msra.mxu1 %v4153_v27  ;;  %3496 = vmatprep.subr.bf16.mxu0 %v4156_v28 }
 0x17b   :  { %3518 = vmatprep.subr.bf16.mxu1 %v4160_v29  ;;  %2629 = vmatprep.mubr.bf16.mxu0 %v3045_v11  ;;  %v4591_v11 = vld [vmem:[#allocation44_spill] sm:$0xff] }
 0x17c   :  { %2669 = vmatprep.mubr.bf16.mxu1 %v3047_v12 }
 0x17d   :  { %3497 = vmatpush3.bf16.msra.mxu0 %v4163_v30 }
 0x17e   :  { %3519 = vmatpush3.bf16.msra.mxu1 %v4166_v31  ;;  %3498 = vmatprep.subr.bf16.mxu0 %v4168_v32  ;;  %v3044_v31 = vcombine.low %v2189_v61, %v2189_v61  ;;  %v2191_v32 = vld [vmem:[#allocation7 + $0x50] sm:$0xff] }
 0x17f   :  { %3520 = vmatprep.subr.bf16.mxu1 %v4172_v33  ;;  %v3046_v33 = vcombine.low %v2190_v10, %v2190_v10  ;;  %v3048_v61 = vcombine.low %v2191_v32, %v2191_v32 }
 0x181   :  { %3499 = vmatpush3.bf16.msra.mxu0 %v4175_v34  ;;  %v2192_v34 = vld [vmem:[#allocation7 + $0x58] sm:$0xff] }
 0x182   :  { %3521 = vmatpush3.bf16.msra.mxu1 %v4178_v35  ;;  %3500 = vmatprep.subr.bf16.mxu0 %v4180_v36  ;;  %v4561_v35 = vld [vmem:[#allocation14_spill] sm:$0xff]  ;;  %v3049_v36 = vcombine.high %v2191_v32, %v2191_v32  ;;  %v3050_v10 = vcombine.low %v2192_v34, %v2192_v34 }
 0x183   :  { %3522 = vmatprep.subr.bf16.mxu1 %v4184_v37  ;;  %v3051_v37 = vcombine.high %v2192_v34, %v2192_v34 }
 0x185   :  { %3501 = vmatpush3.bf16.msra.mxu0 %v4187_v38  ;;  %v4562_v38 = vld [vmem:[#allocation15_spill] sm:$0xff] }
 0x186   :  { %3523 = vmatpush3.bf16.msra.mxu1 %v4190_v39  ;;  %3502 = vmatprep.subr.bf16.mxu0 %v4192_v40  ;;  %v4563_v39 = vld [vmem:[#allocation16_spill] sm:$0xff]  ;;  %v4564_v40 = vld [vmem:[#allocation17_spill] sm:$0xff] }
 0x187   :  { %3524 = vmatprep.subr.bf16.mxu1 %v4196_v41  ;;  %v4565_v41 = vld [vmem:[#allocation18_spill] sm:$0xff] }
 0x189   :  { %3503 = vmatpush3.bf16.msra.mxu0 %v4199_v42  ;;  %v4566_v42 = vld [vmem:[#allocation19_spill] sm:$0xff] }
 0x18a   :  { %3525 = vmatpush3.bf16.msra.mxu1 %v4202_v43  ;;  %3504 = vmatprep.subr.bf16.mxu0 %v4204_v44  ;;  %v4567_v43 = vld [vmem:[#allocation20_spill] sm:$0xff]  ;;  %v4568_v44 = vld [vmem:[#allocation21_spill] sm:$0xff] }
 0x18b   :  { %v3202_v13 = vpop.f32.mrb[12].mxu0  ;;  %3526 = vmatprep.subr.bf16.mxu1 %v4208_v45  ;;  %v4569_v45 = vld [vmem:[#allocation22_spill] sm:$0xff] }
 0x18c   :  { %v3224_v14 = vpop.f32.mrb[12].mxu1  ;;  %v3203_v15 = vpop.f32.mrb[13].mxu0 }
 0x18d   :  { %v3204_v16 = vadd.f32 %v3203_v15, %v3202_v13  ;;  %v3225_v17 = vpop.f32.mrb[13].mxu1  ;;  %v3205_v23 = vpop.f32.mrb[14].mxu0  ;;  %3505 = vmatpush3.bf16.msra.mxu0 %v4211_v46  ;;  %v4570_v46 = vld [vmem:[#allocation23_spill] sm:$0xff] }
 0x18e   :  { %v3226_v25 = vadd.f32 %v3225_v17, %v3224_v14  ;;  %v3227_v26 = vpop.f32.mrb[14].mxu1  ;;  %v3206_v27 = vpop.f32.mrb[15].mxu0  ;;  %3527 = vmatpush3.bf16.msra.mxu1 %v4214_v47  ;;  %3506 = vmatprep.subr.bf16.mxu0 %v4216_v48  ;;  %v4571_v47 = vld [vmem:[#allocation24_spill] sm:$0xff]  ;;  %v4572_v48 = vld [vmem:[#allocation25_spill] sm:$0xff] }
 0x18f   :  { %v1973_v28 = vadd.f32 %v3204_v16, %v1933_v63  ;;  %v3228_v29 = vpop.f32.mrb[15].mxu1  ;;  %3528 = vmatprep.subr.bf16.mxu1 %v4220_v49  ;;  %v4573_v49 = vld [vmem:[#allocation26_spill] sm:$0xff]  ;;  %v4588_v63 = vld [vmem:[#allocation41_spill] sm:$0xff] }
 0x190   :  { %v4469_v29 = vld [vmem:[%s4496_s3] ss:$0 sm:$0xff] }
 0x191   :  { %v2013_v30 = vadd.f32 %v3226_v25, %v1973_v28  ;;  %3507 = vmatpush3.bf16.msra.mxu0 %v4223_v50  ;;  %v4574_v50 = vld [vmem:[#allocation27_spill] sm:$0xff] }
 0x192   :  { %3529 = vmatpush3.bf16.msra.mxu1 %v4226_v51  ;;  %3508 = vmatprep.subr.bf16.mxu0 %v4228_v52  ;;  %v4575_v51 = vld [vmem:[#allocation28_spill] sm:$0xff]  ;;  %v4576_v52 = vld [vmem:[#allocation29_spill] sm:$0xff] }
 0x193   :  { %3530 = vmatprep.subr.bf16.mxu1 %v4232_v53  ;;  %v4577_v53 = vld [vmem:[#allocation30_spill] sm:$0xff] }
 0x195   :  { %3509 = vmatpush3.bf16.msra.mxu0 %v4235_v54  ;;  %v4578_v54 = vld [vmem:[#allocation31_spill] sm:$0xff] }
 0x196   :  { %3531 = vmatpush3.bf16.msra.mxu1 %v4238_v55  ;;  %3538 = vmatprep.subr.bf16.mxu0 %v4242_v62  ;;  %v4579_v55 = vld [vmem:[#allocation32_spill] sm:$0xff]  ;;  %v4580_v62 = vld [vmem:[#allocation33_spill] sm:$0xff] }
 0x197   :  { %3560 = vmatprep.subr.bf16.mxu1 %v4561_v35 }
 0x198   :  { %2630 = vmatmul.mubr.bf16.vlgmr.msra.gmra.mrb[40].mxu0 %v3044_v31 }
 0x199   :  { %2670 = vmatmul.mubr.bf16.vlgmr.msra.gmra.mrb[40].mxu1 %v3046_v33  ;;  %3539 = vmatpush3.bf16.msra.mxu0 %v4562_v38 }
 0x19a   :  { %3561 = vmatpush3.bf16.msra.mxu1 %v4563_v39  ;;  %3540 = vmatprep.subr.bf16.mxu0 %v4564_v40 }
 0x19b   :  { %3562 = vmatprep.subr.bf16.mxu1 %v4565_v41  ;;  %2709 = vmatprep.mubr.bf16.mxu0 %v3049_v36 }
 0x19c   :  { %2749 = vmatprep.mubr.bf16.mxu1 %v3051_v37 }
 0x19d   :  { %3541 = vmatpush3.bf16.msra.mxu0 %v4566_v42 }
 0x19e   :  { %3563 = vmatpush3.bf16.msra.mxu1 %v4567_v43  ;;  %3542 = vmatprep.subr.bf16.mxu0 %v4568_v44 }
 0x19f   :  { %3564 = vmatprep.subr.bf16.mxu1 %v4569_v45 }
 0x1a1   :  { %3543 = vmatpush3.bf16.msra.mxu0 %v4570_v46 }
 0x1a2   :  { %3565 = vmatpush3.bf16.msra.mxu1 %v4571_v47  ;;  %3544 = vmatprep.subr.bf16.mxu0 %v4572_v48 }
 0x1a3   :  { %3566 = vmatprep.subr.bf16.mxu1 %v4573_v49 }
 0x1a5   :  { %3545 = vmatpush3.bf16.msra.mxu0 %v4574_v50 }
 0x1a6   :  { %3567 = vmatpush3.bf16.msra.mxu1 %v4575_v51  ;;  %3546 = vmatprep.subr.bf16.mxu0 %v4576_v52 }
 0x1a7   :  { %3568 = vmatprep.subr.bf16.mxu1 %v4577_v53 }
 0x1a9   :  { %3547 = vmatpush3.bf16.msra.mxu0 %v4578_v54 }
 0x1aa   :  { %3569 = vmatpush3.bf16.msra.mxu1 %v4579_v55  ;;  %3548 = vmatprep.subr.bf16.mxu0 %v4580_v62 }
 0x1ab   :  { %v3246_v5 = vpop.f32.mrb[16].mxu0  ;;  %3570 = vmatprep.subr.bf16.mxu1 %v4581_v3 }
 0x1ac   :  { %v3268_v20 = vpop.f32.mrb[16].mxu1  ;;  %v3247_v56 = vpop.f32.mrb[17].mxu0 }
 0x1ad   :  { %v3269_v1 = vpop.f32.mrb[17].mxu1  ;;  %v3248_v19 = vadd.f32 %v3247_v56, %v3246_v5  ;;  %v3249_v24 = vpop.f32.mrb[18].mxu0  ;;  %3549 = vmatpush3.bf16.msra.mxu0 %v4582_v57 }
 0x1ae   :  { %v3270_v0 = vadd.f32 %v3269_v1, %v3268_v20  ;;  %v3271_v8 = vpop.f32.mrb[18].mxu1  ;;  %3571 = vmatpush3.bf16.msra.mxu1 %v4583_v60  ;;  %v3250_v59 = vpop.f32.mrb[19].mxu0  ;;  %3550 = vmatprep.subr.bf16.mxu0 %v4584_v18 }
 0x1af   :  { %v3272_v6 = vpop.f32.mrb[19].mxu1  ;;  %v2053_v22 = vadd.f32 %v3248_v19, %v2013_v30  ;;  %3572 = vmatprep.subr.bf16.mxu1 %v4585_v58 }
 0x1b1   :  { %v2093_v2 = vadd.f32 %v3270_v0, %v2053_v22  ;;  %3551 = vmatpush3.bf16.msra.mxu0 %v4586_v21 }
 0x1b2   :  { %3573 = vmatpush3.bf16.msra.mxu1 %v4587_v4  ;;  %3552 = vmatprep.subr.bf16.mxu0 %v4588_v63 }
 0x1b3   :  { %3574 = vmatprep.subr.bf16.mxu1 %v4589_v7 }
 0x1b5   :  { %3553 = vmatpush3.bf16.msra.mxu0 %v4590_v9 }
 0x1b6   :  { %3575 = vmatpush3.bf16.msra.mxu1 %v4591_v11 }
 0x1b8   :  { %2710 = vmatmul.mubr.bf16.vlgmr.msra.gmra.mrb[44].mxu0 %v3048_v61 }
 0x1b9   :  { %2750 = vmatmul.mubr.bf16.vlgmr.msra.gmra.mrb[44].mxu1 %v3050_v10 }
 0x1cb   :  { %v3290_v12 = vpop.f32.mrb[20].mxu0 }
 0x1cc   :  { %v3312_v13 = vpop.f32.mrb[20].mxu1  ;;  %v3291_v14 = vpop.f32.mrb[21].mxu0 }
 0x1cd   :  { %v3292_v15 = vadd.f32 %v3291_v14, %v3290_v12  ;;  %v3313_v16 = vpop.f32.mrb[21].mxu1  ;;  %v3293_v17 = vpop.f32.mrb[22].mxu0 }
 0x1ce   :  { %v3314_v23 = vadd.f32 %v3313_v16, %v3312_v13  ;;  %v3315_v25 = vpop.f32.mrb[22].mxu1  ;;  %v3294_v26 = vpop.f32.mrb[23].mxu0 }
 0x1cf   :  { %v2133_v27 = vadd.f32 %v3292_v15, %v2093_v2  ;;  %v3316_v28 = vpop.f32.mrb[23].mxu1 }
 0x1d1   :  { %v2173_v30 = vadd.f32 %v3314_v23, %v2133_v27 }
 0x1d3   :  { %v4472_v31 = vadd.f32 %v4469_v29, %v2173_v30 }
 0x1d5   :  { %v2773_v32 = vmul.f32 %v4472_v31, %v4472_v31 }
 0x1d7   :  { %2774 = vadd.xlane.f32.xlu0 %v2773_v32 }
 0x1eb   :  { %v3334_v33 = vpop.f32.mrb[24].mxu0 }
 0x1ec   :  { %v3356_v34 = vpop.f32.mrb[24].mxu1  ;;  %v3335_v35 = vpop.f32.mrb[25].mxu0 }
 0x1ed   :  { %v3336_v36 = vadd.f32 %v3335_v35, %v3334_v33  ;;  %v3357_v37 = vpop.f32.mrb[25].mxu1  ;;  %v3337_v38 = vpop.f32.mrb[26].mxu0 }
 0x1ee   :  { %v3358_v39 = vadd.f32 %v3357_v37, %v3356_v34  ;;  %v3359_v40 = vpop.f32.mrb[26].mxu1  ;;  %v3338_v41 = vpop.f32.mrb[27].mxu0 }
 0x1ef   :  { %v3360_v42 = vpop.f32.mrb[27].mxu1 }
 0x1f0   :  { %v2352_v43 = vadd.f32 %v3358_v39, %v3336_v36 }
 0x20b   :  { %v3378_v44 = vpop.f32.mrb[28].mxu0 }
 0x20c   :  { %v3400_v45 = vpop.f32.mrb[28].mxu1  ;;  %v3379_v46 = vpop.f32.mrb[29].mxu0 }
 0x20d   :  { %v3380_v47 = vadd.f32 %v3379_v46, %v3378_v44  ;;  %v3401_v48 = vpop.f32.mrb[29].mxu1  ;;  %v3381_v49 = vpop.f32.mrb[30].mxu0 }
 0x20e   :  { %v3402_v50 = vadd.f32 %v3401_v48, %v3400_v45  ;;  %v3403_v51 = vpop.f32.mrb[30].mxu1  ;;  %v3382_v52 = vpop.f32.mrb[31].mxu0 }
 0x20f   :  { %v2392_v53 = vadd.f32 %v3380_v47, %v2352_v43  ;;  %v3404_v54 = vpop.f32.mrb[31].mxu1 }
 0x211   :  { %v2432_v55 = vadd.f32 %v3402_v50, %v2392_v53  ;;  %v3053_v50 = vld [vmem:[%s4497_s4] ss:$0 sm:$0xff] }
 0x22b   :  { %v3422_v62 = vpop.f32.mrb[32].mxu0 }
 0x22c   :  { %v3444_v5 = vpop.f32.mrb[32].mxu1  ;;  %v3423_v20 = vpop.f32.mrb[33].mxu0 }
 0x22d   :  { %v3424_v3 = vadd.f32 %v3423_v20, %v3422_v62  ;;  %v3445_v56 = vpop.f32.mrb[33].mxu1  ;;  %v3425_v1 = vpop.f32.mrb[34].mxu0 }
 0x22e   :  { %v3446_v19 = vadd.f32 %v3445_v56, %v3444_v5  ;;  %v3447_v0 = vpop.f32.mrb[34].mxu1  ;;  %v3426_v24 = vpop.f32.mrb[35].mxu0 }
 0x22f   :  { %v2472_v8 = vadd.f32 %v3424_v3, %v2432_v55  ;;  %v3448_v57 = vpop.f32.mrb[35].mxu1 }
 0x231   :  { %v2512_v60 = vadd.f32 %v3446_v19, %v2472_v8 }
 0x24b   :  { %v3466_v59 = vpop.f32.mrb[36].mxu0 }
 0x24c   :  { %v3488_v6 = vpop.f32.mrb[36].mxu1  ;;  %v3467_v18 = vpop.f32.mrb[37].mxu0 }
 0x24d   :  { %v3468_v22 = vadd.f32 %v3467_v18, %v3466_v59  ;;  %v3489_v58 = vpop.f32.mrb[37].mxu1  ;;  %v3469_v2 = vpop.f32.mrb[38].mxu0 }
 0x24e   :  { %v3490_v21 = vadd.f32 %v3489_v58, %v3488_v6  ;;  %v3491_v4 = vpop.f32.mrb[38].mxu1  ;;  %v3470_v63 = vpop.f32.mrb[39].mxu0 }
 0x24f   :  { %v2552_v7 = vadd.f32 %v3468_v22, %v2512_v60  ;;  %v3492_v61 = vpop.f32.mrb[39].mxu1 }
 0x251   :  { %v2592_v9 = vadd.f32 %v3490_v21, %v2552_v7 }
 0x264   :  { %v2775_v44 = vpop.xlane.xlu0 %2774 }
 0x265   :  { %3828 = vrsqrt.f32 %v2775_v44 }
 0x26b   :  { %v3510_v10 = vpop.f32.mrb[40].mxu0 }
 0x26c   :  { %v3532_v11 = vpop.f32.mrb[40].mxu1  ;;  %v3511_v12 = vpop.f32.mrb[41].mxu0 }
 0x26d   :  { %v3512_v13 = vadd.f32 %v3511_v12, %v3510_v10  ;;  %v3533_v14 = vpop.f32.mrb[41].mxu1  ;;  %v3513_v15 = vpop.f32.mrb[42].mxu0 }
 0x26e   :  { %v3534_v16 = vadd.f32 %v3533_v14, %v3532_v11  ;;  %v3535_v17 = vpop.f32.mrb[42].mxu1  ;;  %v3514_v23 = vpop.f32.mrb[43].mxu0 }
 0x26f   :  { %v2632_v25 = vadd.f32 %v3512_v13, %v2592_v9  ;;  %v3536_v26 = vpop.f32.mrb[43].mxu1  ;;  %v3829_v46 = vpop.eup %3828 }
 0x270   :  { %v2782_v49 = vmul.f32 %v3829_v46, %v4472_v31 }
 0x271   :  { %v2672_v27 = vadd.f32 %v3534_v16, %v2632_v25 }
 0x28b   :  { %v3554_v28 = vpop.f32.mrb[44].mxu0 }
 0x28c   :  { %v3576_v30 = vpop.f32.mrb[44].mxu1  ;;  %v3555_v32 = vpop.f32.mrb[45].mxu0 }
 0x28d   :  { %v3556_v33 = vadd.f32 %v3555_v32, %v3554_v28  ;;  %v3577_v34 = vpop.f32.mrb[45].mxu1  ;;  %v3557_v35 = vpop.f32.mrb[46].mxu0 }
 0x28e   :  { %v3578_v36 = vadd.f32 %v3577_v34, %v3576_v30  ;;  %v3579_v37 = vpop.f32.mrb[46].mxu1  ;;  %v3558_v38 = vpop.f32.mrb[47].mxu0 }
 0x28f   :  { %v2712_v39 = vadd.f32 %v3556_v33, %v2672_v27  ;;  %v3580_v40 = vpop.f32.mrb[47].mxu1 }
 0x291   :  { %v2752_v41 = vadd.f32 %v3578_v36, %v2712_v39 }
 0x293   :  { %v2772_v42 = vadd.f32 %v4469_v29, %v2752_v41 }
 0x295   :  { %v2777_v43 = vmul.f32 %v2772_v42, %v2772_v42 }
 0x297   :  { %2778 = vadd.xlane.f32.xlu0 %v2777_v43 }
 0x324   :  { %v2779_v45 = vpop.xlane.xlu0 %2778 }
 0x325   :  { %3830 = vrsqrt.f32 %v2779_v45 }
 0x32f   :  { %v3831_v47 = vpop.eup %3830 }
 0x330   :  { %v2781_v48 = vmul.f32 %v3831_v47, %v2772_v42 }
 0x332   :  { %v2783_v51 = vsub.f32 %v2781_v48, %v2782_v49 }
 0x334   :  { %v2791_v52 = vmul.f32 %v3053_v50, %v2783_v51 }
 0x336   :  { %2792 = vadd.xlane.f32.xlu1 %v2791_v52 }
 0x3c3   :  { %v2793_v29 = vpop.xlane.xlu1 %2792 }
 0x3c4   :  { %v2794_v53 = vsub.f32 1.0, %v2793_v29 }
 0x3c6   :  { %2795 = vst [vmem:[#allocation10] sm:$0xff] %v2794_v53 }
 0x3c7   :  { %4027 = shalt.err (!%p4024_p0)
}
 0x3c8   :  { %s4028_s4 = scalar_lea.hbm %s4498_s5, 128 }
 0x3c9   :  { %p4029_p1 = scmp.ne.s32.totalorder %s4498_s5, %s4028_s4  ;;  %p4032_p2 = scmp.lt.u32.totalorder %s4028_s4, %s4498_s5 }
 0x3cb   :  { %p4034_p3 = pnand %p4032_p2, %p4029_p1 }
 0x3cd   :  { %4037 = shalt.err (!%p4034_p3)
}
 0x3ce   :  { %2805 = dma.vmem_to_hbm [thread:$0]  %s2803_s7, 128, %s4498_s5, [#allocation6]  }
 0x3cf   :  { %4042 = dma.done.wait [#allocation6], 128  }
 0x3d0   :  { %4043 = vsyncadd [#allocation6], 4294967168 }
 0x3d1   :  { %2809 = vsyncpa [#allocation5], 1 }
 0x3d2   :  { %2810 = vsyncpa [#allocation8], 1 }
 0x3d3   :  { %2811 = vsyncpa [#allocation6], 1 }

</bundles_post_ra>
